<compile_context>
chip_gen: v5e
topology: v5e:2x2
jax: 0.10.0
libtpu: 0.0.40
codegen_flags: <defaults>
</compile_context>

<pallas_src>
import functools
import math

import jax
import jax.numpy as jnp
from jax.experimental import pallas as pl
from jax.experimental.pallas import tpu as pltpu

EPS = 1e-5  # PyTorch InstanceNorm3d default


# ---------------------------------------------------------------------------
# chip-gated sizing
# ---------------------------------------------------------------------------
def _physical_vmem_bytes():
    try:
        cap = int(pltpu.get_tpu_info().vmem_capacity_bytes)
    except Exception:
        cap = 64 << 20          # conservative (v7x) default
    return min(max(cap, 32 << 20), 256 << 20)


VMEM_CAP = _physical_vmem_bytes()
# Fused kernel keeps ~5-7x the slab live (double-buffered in/out + f32 temps),
# so gate on the f32 slab at VMEM/16: 4 MiB on v7x (64 MiB), 8 MiB on v5e/v6e.
FUSED_SLAB_F32_LIMIT = VMEM_CAP // 16
FUSED_VMEM_LIMIT = min(VMEM_CAP * 3 // 4, 100 << 20)
STREAM_VMEM_LIMIT = min(VMEM_CAP // 2, 64 << 20)
STREAM_TILE_F32_BUDGET = min(4 << 20, VMEM_CAP // 16)   # 4 MiB blocks everywhere


# ---------------------------------------------------------------------------
# fused single-pass kernel: one (1, R, L) block per batch element.
# lane l holds channel (l % C); each channel appears R * (L // C) = d*h*w times.
# ---------------------------------------------------------------------------
def _fused_instnorm_kernel(x_ref, o_ref, *, C):
    x = x_ref[0].astype(jnp.float32)                      # (R, L)
    R, L = x.shape
    G = L // C
    n = float(R * G)                                      # = d*h*w per channel

    # one pass: per-lane sum and sum-of-squares (no centered slab temporary)
    s1 = jnp.sum(x, axis=0, keepdims=True)                # (1, L)
    s2 = jnp.sum(x * x, axis=0, keepdims=True)            # (1, L)

    # fold the G lane-groups into the C channels with static lane slices
    # (tiny vectors; hidden under the HBM DMA).
    s1c = s1[:, 0:C]
    s2c = s2[:, 0:C]
    for g in range(1, G):
        s1c = s1c + s1[:, g * C:(g + 1) * C]
        s2c = s2c + s2[:, g * C:(g + 1) * C]
    mean_c = s1c / n
    var_c = jnp.maximum(s2c / n - mean_c * mean_c, 0.0)   # biased variance
    scale_c = jax.lax.rsqrt(var_c + EPS)
    mean_l = jnp.concatenate([mean_c] * G, axis=1)        # (1, L)
    scale_l = jnp.concatenate([scale_c] * G, axis=1)      # (1, L)

    # fused normalize + cast + store: no extra slab intermediate
    o_ref[0] = ((x - mean_l) * scale_l).astype(o_ref.dtype)


# ---------------------------------------------------------------------------
# streaming two-phase kernels (large slabs): bounded VMEM, deep pipelining.
# ---------------------------------------------------------------------------
def _stats_kernel(x_ref, s1_ref, s2_ref):
    # grid = (outer, nR); program_id(1) is the accumulation axis.
    @pl.when(pl.program_id(1) == 0)
    def _init():
        s1_ref[...] = jnp.zeros_like(s1_ref)
        s2_ref[...] = jnp.zeros_like(s2_ref)

    x = x_ref[0].astype(jnp.float32)                      # (TR, L)
    s1_ref[0] = s1_ref[0] + jnp.sum(x, axis=0, keepdims=True)
    s2_ref[0] = s2_ref[0] + jnp.sum(x * x, axis=0, keepdims=True)


def _apply_folded_kernel(x_ref, s1_ref, s2_ref, o_ref, mean_sc, scale_sc, *, C, n):
    # per-channel fold / rsqrt / lane-broadcast done once per batch element
    # (first row-tile step) and kept in VMEM scratch for the remaining steps.
    @pl.when(pl.program_id(1) == 0)
    def _fold():
        s1 = s1_ref[0]                                    # (1, L)
        s2 = s2_ref[0]
        L = s1.shape[-1]
        G = L // C
        s1c = s1[:, 0:C]
        s2c = s2[:, 0:C]
        for g in range(1, G):
            s1c = s1c + s1[:, g * C:(g + 1) * C]
            s2c = s2c + s2[:, g * C:(g + 1) * C]
        mean_c = s1c / n
        var_c = jnp.maximum(s2c / n - mean_c * mean_c, 0.0)
        scale_c = jax.lax.rsqrt(var_c + EPS)
        mean_sc[...] = jnp.concatenate([mean_c] * G, axis=1)
        scale_sc[...] = jnp.concatenate([scale_c] * G, axis=1)

    x = x_ref[0].astype(jnp.float32)                      # (TR, L)
    o_ref[0] = ((x - mean_sc[...]) * scale_sc[...]).astype(o_ref.dtype)


def _apply_kernel(x_ref, mean_ref, scale_ref, o_ref):
    x = x_ref[0].astype(jnp.float32)
    o_ref[0] = ((x - mean_ref[0]) * scale_ref[0]).astype(o_ref.dtype)


def _pick_row_tile(R, L, itemsize):
    """Largest power-of-two row tile dividing R, respecting the sublane
    multiple for the dtype, with one f32 block <= ~4 MiB."""
    min_mult = max(8, 32 // max(int(itemsize), 1))        # 8 f32 / 16 bf16 / 32 int8
    budget = STREAM_TILE_F32_BUDGET
    best = None
    tr = min_mult
    while tr <= R:
        if R % tr == 0 and tr * L * 4 <= budget:
            best = tr
        tr *= 2
    return best if best is not None else R                # full dim always legal


# ---------------------------------------------------------------------------
# pallas_call wrappers
# ---------------------------------------------------------------------------
def _instnorm_fused(x_rl, C):
    B, R, L = x_rl.shape
    return pl.pallas_call(
        functools.partial(_fused_instnorm_kernel, C=C),
        out_shape=jax.ShapeDtypeStruct((B, R, L), x_rl.dtype),
        grid_spec=pltpu.PrefetchScalarGridSpec(
            num_scalar_prefetch=0,
            grid=(B,),
            in_specs=[pl.BlockSpec((1, R, L), lambda b: (b, 0, 0))],
            out_specs=pl.BlockSpec((1, R, L), lambda b: (b, 0, 0)),
        ),
        compiler_params=pltpu.CompilerParams(
            dimension_semantics=("parallel",),
            vmem_limit_bytes=FUSED_VMEM_LIMIT),
    )(x_rl)


def _instnorm_streaming_folded(x_rl, C, TR, nR):
    B, R, L = x_rl.shape
    G = L // C
    n = float(R * G)

    # phase 1: per-(batch, lane) sum / sum-of-squares over row tiles
    s1, s2 = pl.pallas_call(
        _stats_kernel,
        out_shape=(jax.ShapeDtypeStruct((B, 1, L), jnp.float32),
                   jax.ShapeDtypeStruct((B, 1, L), jnp.float32)),
        grid_spec=pltpu.PrefetchScalarGridSpec(
            num_scalar_prefetch=0,
            grid=(B, nR),
            in_specs=[pl.BlockSpec((1, TR, L), lambda b, r: (b, r, 0))],
            out_specs=(pl.BlockSpec((1, 1, L), lambda b, r: (b, 0, 0)),
                       pl.BlockSpec((1, 1, L), lambda b, r: (b, 0, 0))),
        ),
        compiler_params=pltpu.CompilerParams(
            dimension_semantics=("parallel", "arbitrary"),
            vmem_limit_bytes=STREAM_VMEM_LIMIT),
    )(x_rl)

    # phase 2: normalize; per-channel math folded into the first grid step
    return pl.pallas_call(
        functools.partial(_apply_folded_kernel, C=C, n=n),
        out_shape=jax.ShapeDtypeStruct((B, R, L), x_rl.dtype),
        grid_spec=pltpu.PrefetchScalarGridSpec(
            num_scalar_prefetch=0,
            grid=(B, nR),
            in_specs=[pl.BlockSpec((1, TR, L), lambda b, r: (b, r, 0)),
                      pl.BlockSpec((1, 1, L), lambda b, r: (b, 0, 0)),
                      pl.BlockSpec((1, 1, L), lambda b, r: (b, 0, 0))],
            out_specs=pl.BlockSpec((1, TR, L), lambda b, r: (b, r, 0)),
            scratch_shapes=[pltpu.VMEM((1, L), jnp.float32),
                            pltpu.VMEM((1, L), jnp.float32)],
        ),
        compiler_params=pltpu.CompilerParams(
            dimension_semantics=("parallel", "arbitrary"),
            vmem_limit_bytes=STREAM_VMEM_LIMIT),
    )(x_rl, s1, s2)


def _instnorm_streaming_split(x_rl, C, TR, nR):
    """B == 1: split the row-tile axis into a leading 2-way parallel axis so
    both v7x TensorCores are busy (no-op cost on single-core chips)."""
    _, R, L = x_rl.shape
    G = L // C
    S = R * G
    H = 2
    nRh = nR // H

    s1, s2 = pl.pallas_call(
        _stats_kernel,
        out_shape=(jax.ShapeDtypeStruct((H, 1, L), jnp.float32),
                   jax.ShapeDtypeStruct((H, 1, L), jnp.float32)),
        grid_spec=pltpu.PrefetchScalarGridSpec(
            num_scalar_prefetch=0,
            grid=(H, nRh),
            in_specs=[pl.BlockSpec((1, TR, L),
                                   lambda hh, r, nRh=nRh: (0, hh * nRh + r, 0))],
            out_specs=(pl.BlockSpec((1, 1, L), lambda hh, r: (hh, 0, 0)),
                       pl.BlockSpec((1, 1, L), lambda hh, r: (hh, 0, 0))),
        ),
        compiler_params=pltpu.CompilerParams(
            dimension_semantics=("parallel", "arbitrary"),
            vmem_limit_bytes=STREAM_VMEM_LIMIT),
    )(x_rl)

    # tiny per-channel math in plain JAX (a few KiB of traffic)
    s1c = s1.sum(axis=0).reshape(G, C).sum(axis=0)        # (C,)
    s2c = s2.sum(axis=0).reshape(G, C).sum(axis=0)
    mean_c = s1c / S
    var_c = jnp.maximum(s2c / S - mean_c * mean_c, 0.0)
    scale_c = jax.lax.rsqrt(var_c + EPS)
    mean_l = jnp.tile(mean_c, G).reshape(1, 1, L)         # lane l -> channel l % C
    scale_l = jnp.tile(scale_c, G).reshape(1, 1, L)

    return pl.pallas_call(
        _apply_kernel,
        out_shape=jax.ShapeDtypeStruct((1, R, L), x_rl.dtype),
        grid_spec=pltpu.PrefetchScalarGridSpec(
            num_scalar_prefetch=0,
            grid=(H, nRh),
            in_specs=[pl.BlockSpec((1, TR, L),
                                   lambda hh, r, nRh=nRh: (0, hh * nRh + r, 0)),
                      pl.BlockSpec((1, 1, L), lambda hh, r: (0, 0, 0)),
                      pl.BlockSpec((1, 1, L), lambda hh, r: (0, 0, 0))],
            out_specs=pl.BlockSpec((1, TR, L),
                                   lambda hh, r, nRh=nRh: (0, hh * nRh + r, 0)),
        ),
        compiler_params=pltpu.CompilerParams(
            dimension_semantics=("parallel", "parallel"),
            vmem_limit_bytes=STREAM_VMEM_LIMIT),
    )(x_rl, mean_l, scale_l)


def _instnorm_streaming(x_rl, C):
    B, R, L = x_rl.shape
    TR = _pick_row_tile(R, L, x_rl.dtype.itemsize)
    nR = R // TR
    if B == 1 and nR >= 2 and nR % 2 == 0:
        return _instnorm_streaming_split(x_rl, C, TR, nR)
    return _instnorm_streaming_folded(x_rl, C, TR, nR)


# ---------------------------------------------------------------------------
# fallback for shapes that cannot be retiled into lane-dense (R, L) blocks:
# tiled + masked streaming over the spatial axis (bounded VMEM).
# ---------------------------------------------------------------------------
def _fb_stats_kernel(x_ref, s1_ref, s2_ref, *, S, TS):
    r = pl.program_id(1)

    @pl.when(r == 0)
    def _init():
        s1_ref[...] = jnp.zeros_like(s1_ref)
        s2_ref[...] = jnp.zeros_like(s2_ref)

    x = x_ref[0].astype(jnp.float32)                      # (TS, C)
    row = r * TS + jax.lax.broadcasted_iota(jnp.int32, x.shape, 0)
    x = jnp.where(row < S, x, 0.0)                        # mask padded tail rows
    s1_ref[0] = s1_ref[0] + jnp.sum(x, axis=0, keepdims=True)
    s2_ref[0] = s2_ref[0] + jnp.sum(x * x, axis=0, keepdims=True)


def _instnorm_fallback(x3):
    # TODO(synk): lanes are only C wide here (< 128 for odd geometries), so
    # stores are masked; packing ceil(128/C) spatial rows per lane row would
    # make them dense at the cost of a repacking pass.
    B, S, C = x3.shape
    itemsize = max(int(x3.dtype.itemsize), 1)
    min_mult = max(8, 32 // itemsize)
    Cp = ((C + 127) // 128) * 128                         # VMEM lane padding
    budget = STREAM_TILE_F32_BUDGET
    if S * Cp * 4 <= budget:
        TS = S                                            # whole extent, one block
    else:
        TS = min_mult
        while TS * 2 * Cp * 4 <= budget and TS * 2 < S:
            TS *= 2
    nS = pl.cdiv(S, TS)

    s1, s2 = pl.pallas_call(
        functools.partial(_fb_stats_kernel, S=S, TS=TS),
        out_shape=(jax.ShapeDtypeStruct((B, 1, C), jnp.float32),
                   jax.ShapeDtypeStruct((B, 1, C), jnp.float32)),
        grid_spec=pltpu.PrefetchScalarGridSpec(
            num_scalar_prefetch=0,
            grid=(B, nS),
            in_specs=[pl.BlockSpec((1, TS, C), lambda b, r: (b, r, 0))],
            out_specs=(pl.BlockSpec((1, 1, C), lambda b, r: (b, 0, 0)),
                       pl.BlockSpec((1, 1, C), lambda b, r: (b, 0, 0))),
        ),
        compiler_params=pltpu.CompilerParams(
            dimension_semantics=("parallel", "arbitrary"),
            vmem_limit_bytes=STREAM_VMEM_LIMIT),
    )(x3)

    mean = s1 / S                                         # (B, 1, C)
    var = jnp.maximum(s2 / S - mean * mean, 0.0)
    scale = jax.lax.rsqrt(var + EPS)

    return pl.pallas_call(
        _apply_kernel,
        out_shape=jax.ShapeDtypeStruct((B, S, C), x3.dtype),
        grid_spec=pltpu.PrefetchScalarGridSpec(
            num_scalar_prefetch=0,
            grid=(B, nS),
            in_specs=[pl.BlockSpec((1, TS, C), lambda b, r: (b, r, 0)),
                      pl.BlockSpec((1, 1, C), lambda b, r: (b, 0, 0)),
                      pl.BlockSpec((1, 1, C), lambda b, r: (b, 0, 0))],
            out_specs=pl.BlockSpec((1, TS, C), lambda b, r: (b, r, 0)),
        ),
        compiler_params=pltpu.CompilerParams(
            dimension_semantics=("parallel", "parallel"),
            vmem_limit_bytes=STREAM_VMEM_LIMIT),
    )(x3, mean, scale)


# ---------------------------------------------------------------------------
# public wrapper
# ---------------------------------------------------------------------------
def normalize_capsule(x, *, fused_slab_bytes=None):
    """x: (B, d, h, w, num_cap, num_atom) -> same shape, instance-normalized
    per (batch, capsule-channel) over the (d, h, w) spatial dims."""
    assert x.ndim == 6, "The input is not a 3-D capsule."
    B, d, h, w, nc, na = x.shape
    C = nc * na
    S = d * h * w
    total = S * C
    if fused_slab_bytes is None:
        fused_slab_bytes = FUSED_SLAB_F32_LIMIT

    lane_base = math.lcm(C, 128)
    if total % lane_base != 0:
        out = _instnorm_fallback(x.reshape(B, S, C))
        return out.reshape(x.shape)

    # Lane-dense view of the native memory order (free bitcast reshape):
    #   (B, d, h, w, nc, na) -> (B, R, L), L % 128 == 0, channel(lane l) = l % C
    L = lane_base
    while L * 2 <= 2048 and total % (L * 2) == 0:
        L *= 2
    R = total // L
    x_rl = x.reshape(B, R, L)

    if R * L * 4 <= fused_slab_bytes:
        out = _instnorm_fused(x_rl, C)        # single pass: 1 read + 1 write
    else:
        out = _instnorm_streaming(x_rl, C)    # two-phase: 2 reads + 1 write
    return out.reshape(x.shape)


# ---------------------------------------------------------------------------
# pure-JAX reference (InstanceNorm3d, affine=False, eps=1e-5, biased variance)
# ---------------------------------------------------------------------------
def _reference(x):
    B, d, h, w, nc, na = x.shape
    C, S = nc * na, d * h * w
    xf = x.astype(jnp.float32).reshape(B, S, C)
    mean = xf.mean(axis=1, keepdims=True)
    var = ((xf - mean) ** 2).mean(axis=1, keepdims=True)
    out = (xf - mean) * jax.lax.rsqrt(var + EPS)
    return out.reshape(x.shape).astype(x.dtype)


if __name__ == "__main__":
    key = jax.random.PRNGKey(0)
    keys = jax.random.split(key, 6)

    def check(x, atol=2e-4):
        y = jax.block_until_ready(normalize_capsule(x))
        assert y.shape == x.shape and y.dtype == x.dtype
        ref = _reference(x)
        assert jnp.allclose(y.astype(jnp.float32), ref.astype(jnp.float32),
                            atol=atol, rtol=atol), "kernel/reference mismatch"

    # 1) small capsule -> fused single-pass path (1 read + 1 write)
    check(jax.random.normal(keys[0], (2, 4, 8, 8, 4, 8), dtype=jnp.float32))
    # 2) medium capsule (4 MiB/batch slab) -> fused path on every chip
    check(jax.random.normal(keys[1], (2, 16, 16, 32, 8, 16), dtype=jnp.float32))
    # 3) large capsule (16 MiB/batch slab) -> streaming two-phase (folded) path
    check(jax.random.normal(keys[2], (2, 32, 32, 32, 8, 16), dtype=jnp.float32),
          atol=5e-4)
    # 4) large capsule, batch=1 -> streaming path with 2-way parallel row split
    check(jax.random.normal(keys[3], (1, 32, 32, 32, 8, 16), dtype=jnp.float32),
          atol=5e-4)
    # 5) odd capsule geometry (C=15) -> tiled masked fallback path
    check(jax.random.normal(keys[4], (2, 3, 5, 7, 3, 5), dtype=jnp.float32))
    # 6) bf16 input through the fused path
    check(jax.random.normal(keys[5], (2, 4, 8, 8, 4, 8), dtype=jnp.bfloat16),
          atol=1e-1)

    print("KERNEL_OK")
</pallas_src>

<mosaic_0001>
module attributes {stable_mosaic.version = 11 : i64} {
  func.func @_fused_instnorm_kernel(%arg0: i32, %arg1: memref<1x4x2048xf32, #tpu.memory_space<vmem>>, %arg2: memref<1x4x2048xf32, #tpu.memory_space<vmem>>) attributes {dimension_semantics = [#tpu.dimension_semantics<parallel>], iteration_bounds = array<i64: 2>, scalar_prefetch = 0 : i64, scratch_operands = 0 : i64, tpu.core_type = #tpu.core_type<tc>, window_params = [{transform_indices = @transform_0, window_bounds = array<i64: 1, 4, 2048>}, {transform_indices = @transform_1, window_bounds = array<i64: 1, 4, 2048>}]} {
    %c0 = arith.constant 0 : index
    %c0_0 = arith.constant 0 : index
    %c0_1 = arith.constant 0 : index
    %0 = vector.load %arg1[%c0, %c0_0, %c0_1] : memref<1x4x2048xf32, #tpu.memory_space<vmem>>, vector<1x4x2048xf32>
    %1 = vector.shape_cast %0 : vector<1x4x2048xf32> to vector<4x2048xf32>
    %cst = arith.constant dense<0.000000e+00> : vector<2048xf32>
    %2 = vector.multi_reduction <add>, %1, %cst [0] : vector<4x2048xf32> to vector<2048xf32>
    %3 = vector.shape_cast %2 : vector<2048xf32> to vector<1x2048xf32>
    %4 = arith.mulf %1, %1 : vector<4x2048xf32>
    %cst_2 = arith.constant dense<0.000000e+00> : vector<2048xf32>
    %5 = vector.multi_reduction <add>, %4, %cst_2 [0] : vector<4x2048xf32> to vector<2048xf32>
    %6 = vector.shape_cast %5 : vector<2048xf32> to vector<1x2048xf32>
    %7 = vector.extract_strided_slice %3 {offsets = [0, 0], sizes = [1, 32], strides = [1, 1]} : vector<1x2048xf32> to vector<1x32xf32>
    %8 = vector.extract_strided_slice %6 {offsets = [0, 0], sizes = [1, 32], strides = [1, 1]} : vector<1x2048xf32> to vector<1x32xf32>
    %9 = vector.extract_strided_slice %3 {offsets = [0, 32], sizes = [1, 32], strides = [1, 1]} : vector<1x2048xf32> to vector<1x32xf32>
    %10 = arith.addf %7, %9 : vector<1x32xf32>
    %11 = vector.extract_strided_slice %6 {offsets = [0, 32], sizes = [1, 32], strides = [1, 1]} : vector<1x2048xf32> to vector<1x32xf32>
    %12 = arith.addf %8, %11 : vector<1x32xf32>
    %13 = vector.extract_strided_slice %3 {offsets = [0, 64], sizes = [1, 32], strides = [1, 1]} : vector<1x2048xf32> to vector<1x32xf32>
    %14 = arith.addf %10, %13 : vector<1x32xf32>
    %15 = vector.extract_strided_slice %6 {offsets = [0, 64], sizes = [1, 32], strides = [1, 1]} : vector<1x2048xf32> to vector<1x32xf32>
    %16 = arith.addf %12, %15 : vector<1x32xf32>
    %17 = vector.extract_strided_slice %3 {offsets = [0, 96], sizes = [1, 32], strides = [1, 1]} : vector<1x2048xf32> to vector<1x32xf32>
    %18 = arith.addf %14, %17 : vector<1x32xf32>
    %19 = vector.extract_strided_slice %6 {offsets = [0, 96], sizes = [1, 32], strides = [1, 1]} : vector<1x2048xf32> to vector<1x32xf32>
    %20 = arith.addf %16, %19 : vector<1x32xf32>
    %21 = vector.extract_strided_slice %3 {offsets = [0, 128], sizes = [1, 32], strides = [1, 1]} : vector<1x2048xf32> to vector<1x32xf32>
    %22 = arith.addf %18, %21 : vector<1x32xf32>
    %23 = vector.extract_strided_slice %6 {offsets = [0, 128], sizes = [1, 32], strides = [1, 1]} : vector<1x2048xf32> to vector<1x32xf32>
    %24 = arith.addf %20, %23 : vector<1x32xf32>
    %25 = vector.extract_strided_slice %3 {offsets = [0, 160], sizes = [1, 32], strides = [1, 1]} : vector<1x2048xf32> to vector<1x32xf32>
    %26 = arith.addf %22, %25 : vector<1x32xf32>
    %27 = vector.extract_strided_slice %6 {offsets = [0, 160], sizes = [1, 32], strides = [1, 1]} : vector<1x2048xf32> to vector<1x32xf32>
    %28 = arith.addf %24, %27 : vector<1x32xf32>
    %29 = vector.extract_strided_slice %3 {offsets = [0, 192], sizes = [1, 32], strides = [1, 1]} : vector<1x2048xf32> to vector<1x32xf32>
    %30 = arith.addf %26, %29 : vector<1x32xf32>
    %31 = vector.extract_strided_slice %6 {offsets = [0, 192], sizes = [1, 32], strides = [1, 1]} : vector<1x2048xf32> to vector<1x32xf32>
    %32 = arith.addf %28, %31 : vector<1x32xf32>
    %33 = vector.extract_strided_slice %3 {offsets = [0, 224], sizes = [1, 32], strides = [1, 1]} : vector<1x2048xf32> to vector<1x32xf32>
    %34 = arith.addf %30, %33 : vector<1x32xf32>
    %35 = vector.extract_strided_slice %6 {offsets = [0, 224], sizes = [1, 32], strides = [1, 1]} : vector<1x2048xf32> to vector<1x32xf32>
    %36 = arith.addf %32, %35 : vector<1x32xf32>
    %37 = vector.extract_strided_slice %3 {offsets = [0, 256], sizes = [1, 32], strides = [1, 1]} : vector<1x2048xf32> to vector<1x32xf32>
    %38 = arith.addf %34, %37 : vector<1x32xf32>
    %39 = vector.extract_strided_slice %6 {offsets = [0, 256], sizes = [1, 32], strides = [1, 1]} : vector<1x2048xf32> to vector<1x32xf32>
    %40 = arith.addf %36, %39 : vector<1x32xf32>
    %41 = vector.extract_strided_slice %3 {offsets = [0, 288], sizes = [1, 32], strides = [1, 1]} : vector<1x2048xf32> to vector<1x32xf32>
    %42 = arith.addf %38, %41 : vector<1x32xf32>
    %43 = vector.extract_strided_slice %6 {offsets = [0, 288], sizes = [1, 32], strides = [1, 1]} : vector<1x2048xf32> to vector<1x32xf32>
    %44 = arith.addf %40, %43 : vector<1x32xf32>
    %45 = vector.extract_strided_slice %3 {offsets = [0, 320], sizes = [1, 32], strides = [1, 1]} : vector<1x2048xf32> to vector<1x32xf32>
    %46 = arith.addf %42, %45 : vector<1x32xf32>
    %47 = vector.extract_strided_slice %6 {offsets = [0, 320], sizes = [1, 32], strides = [1, 1]} : vector<1x2048xf32> to vector<1x32xf32>
    %48 = arith.addf %44, %47 : vector<1x32xf32>
    %49 = vector.extract_strided_slice %3 {offsets = [0, 352], sizes = [1, 32], strides = [1, 1]} : vector<1x2048xf32> to vector<1x32xf32>
    %50 = arith.addf %46, %49 : vector<1x32xf32>
    %51 = vector.extract_strided_slice %6 {offsets = [0, 352], sizes = [1, 32], strides = [1, 1]} : vector<1x2048xf32> to vector<1x32xf32>
    %52 = arith.addf %48, %51 : vector<1x32xf32>
    %53 = vector.extract_strided_slice %3 {offsets = [0, 384], sizes = [1, 32], strides = [1, 1]} : vector<1x2048xf32> to vector<1x32xf32>
    %54 = arith.addf %50, %53 : vector<1x32xf32>
    %55 = vector.extract_strided_slice %6 {offsets = [0, 384], sizes = [1, 32], strides = [1, 1]} : vector<1x2048xf32> to vector<1x32xf32>
    %56 = arith.addf %52, %55 : vector<1x32xf32>
    %57 = vector.extract_strided_slice %3 {offsets = [0, 416], sizes = [1, 32], strides = [1, 1]} : vector<1x2048xf32> to vector<1x32xf32>
    %58 = arith.addf %54, %57 : vector<1x32xf32>
    %59 = vector.extract_strided_slice %6 {offsets = [0, 416], sizes = [1, 32], strides = [1, 1]} : vector<1x2048xf32> to vector<1x32xf32>
    %60 = arith.addf %56, %59 : vector<1x32xf32>
    %61 = vector.extract_strided_slice %3 {offsets = [0, 448], sizes = [1, 32], strides = [1, 1]} : vector<1x2048xf32> to vector<1x32xf32>
    %62 = arith.addf %58, %61 : vector<1x32xf32>
    %63 = vector.extract_strided_slice %6 {offsets = [0, 448], sizes = [1, 32], strides = [1, 1]} : vector<1x2048xf32> to vector<1x32xf32>
    %64 = arith.addf %60, %63 : vector<1x32xf32>
    %65 = vector.extract_strided_slice %3 {offsets = [0, 480], sizes = [1, 32], strides = [1, 1]} : vector<1x2048xf32> to vector<1x32xf32>
    %66 = arith.addf %62, %65 : vector<1x32xf32>
    %67 = vector.extract_strided_slice %6 {offsets = [0, 480], sizes = [1, 32], strides = [1, 1]} : vector<1x2048xf32> to vector<1x32xf32>
    %68 = arith.addf %64, %67 : vector<1x32xf32>
    %69 = vector.extract_strided_slice %3 {offsets = [0, 512], sizes = [1, 32], strides = [1, 1]} : vector<1x2048xf32> to vector<1x32xf32>
    %70 = arith.addf %66, %69 : vector<1x32xf32>
    %71 = vector.extract_strided_slice %6 {offsets = [0, 512], sizes = [1, 32], strides = [1, 1]} : vector<1x2048xf32> to vector<1x32xf32>
    %72 = arith.addf %68, %71 : vector<1x32xf32>
    %73 = vector.extract_strided_slice %3 {offsets = [0, 544], sizes = [1, 32], strides = [1, 1]} : vector<1x2048xf32> to vector<1x32xf32>
    %74 = arith.addf %70, %73 : vector<1x32xf32>
    %75 = vector.extract_strided_slice %6 {offsets = [0, 544], sizes = [1, 32], strides = [1, 1]} : vector<1x2048xf32> to vector<1x32xf32>
    %76 = arith.addf %72, %75 : vector<1x32xf32>
    %77 = vector.extract_strided_slice %3 {offsets = [0, 576], sizes = [1, 32], strides = [1, 1]} : vector<1x2048xf32> to vector<1x32xf32>
    %78 = arith.addf %74, %77 : vector<1x32xf32>
    %79 = vector.extract_strided_slice %6 {offsets = [0, 576], sizes = [1, 32], strides = [1, 1]} : vector<1x2048xf32> to vector<1x32xf32>
    %80 = arith.addf %76, %79 : vector<1x32xf32>
    %81 = vector.extract_strided_slice %3 {offsets = [0, 608], sizes = [1, 32], strides = [1, 1]} : vector<1x2048xf32> to vector<1x32xf32>
    %82 = arith.addf %78, %81 : vector<1x32xf32>
    %83 = vector.extract_strided_slice %6 {offsets = [0, 608], sizes = [1, 32], strides = [1, 1]} : vector<1x2048xf32> to vector<1x32xf32>
    %84 = arith.addf %80, %83 : vector<1x32xf32>
    %85 = vector.extract_strided_slice %3 {offsets = [0, 640], sizes = [1, 32], strides = [1, 1]} : vector<1x2048xf32> to vector<1x32xf32>
    %86 = arith.addf %82, %85 : vector<1x32xf32>
    %87 = vector.extract_strided_slice %6 {offsets = [0, 640], sizes = [1, 32], strides = [1, 1]} : vector<1x2048xf32> to vector<1x32xf32>
    %88 = arith.addf %84, %87 : vector<1x32xf32>
    %89 = vector.extract_strided_slice %3 {offsets = [0, 672], sizes = [1, 32], strides = [1, 1]} : vector<1x2048xf32> to vector<1x32xf32>
    %90 = arith.addf %86, %89 : vector<1x32xf32>
    %91 = vector.extract_strided_slice %6 {offsets = [0, 672], sizes = [1, 32], strides = [1, 1]} : vector<1x2048xf32> to vector<1x32xf32>
    %92 = arith.addf %88, %91 : vector<1x32xf32>
    %93 = vector.extract_strided_slice %3 {offsets = [0, 704], sizes = [1, 32], strides = [1, 1]} : vector<1x2048xf32> to vector<1x32xf32>
    %94 = arith.addf %90, %93 : vector<1x32xf32>
    %95 = vector.extract_strided_slice %6 {offsets = [0, 704], sizes = [1, 32], strides = [1, 1]} : vector<1x2048xf32> to vector<1x32xf32>
    %96 = arith.addf %92, %95 : vector<1x32xf32>
    %97 = vector.extract_strided_slice %3 {offsets = [0, 736], sizes = [1, 32], strides = [1, 1]} : vector<1x2048xf32> to vector<1x32xf32>
    %98 = arith.addf %94, %97 : vector<1x32xf32>
    %99 = vector.extract_strided_slice %6 {offsets = [0, 736], sizes = [1, 32], strides = [1, 1]} : vector<1x2048xf32> to vector<1x32xf32>
    %100 = arith.addf %96, %99 : vector<1x32xf32>
    %101 = vector.extract_strided_slice %3 {offsets = [0, 768], sizes = [1, 32], strides = [1, 1]} : vector<1x2048xf32> to vector<1x32xf32>
    %102 = arith.addf %98, %101 : vector<1x32xf32>
    %103 = vector.extract_strided_slice %6 {offsets = [0, 768], sizes = [1, 32], strides = [1, 1]} : vector<1x2048xf32> to vector<1x32xf32>
    %104 = arith.addf %100, %103 : vector<1x32xf32>
    %105 = vector.extract_strided_slice %3 {offsets = [0, 800], sizes = [1, 32], strides = [1, 1]} : vector<1x2048xf32> to vector<1x32xf32>
    %106 = arith.addf %102, %105 : vector<1x32xf32>
    %107 = vector.extract_strided_slice %6 {offsets = [0, 800], sizes = [1, 32], strides = [1, 1]} : vector<1x2048xf32> to vector<1x32xf32>
    %108 = arith.addf %104, %107 : vector<1x32xf32>
    %109 = vector.extract_strided_slice %3 {offsets = [0, 832], sizes = [1, 32], strides = [1, 1]} : vector<1x2048xf32> to vector<1x32xf32>
    %110 = arith.addf %106, %109 : vector<1x32xf32>
    %111 = vector.extract_strided_slice %6 {offsets = [0, 832], sizes = [1, 32], strides = [1, 1]} : vector<1x2048xf32> to vector<1x32xf32>
    %112 = arith.addf %108, %111 : vector<1x32xf32>
    %113 = vector.extract_strided_slice %3 {offsets = [0, 864], sizes = [1, 32], strides = [1, 1]} : vector<1x2048xf32> to vector<1x32xf32>
    %114 = arith.addf %110, %113 : vector<1x32xf32>
    %115 = vector.extract_strided_slice %6 {offsets = [0, 864], sizes = [1, 32], strides = [1, 1]} : vector<1x2048xf32> to vector<1x32xf32>
    %116 = arith.addf %112, %115 : vector<1x32xf32>
    %117 = vector.extract_strided_slice %3 {offsets = [0, 896], sizes = [1, 32], strides = [1, 1]} : vector<1x2048xf32> to vector<1x32xf32>
    %118 = arith.addf %114, %117 : vector<1x32xf32>
    %119 = vector.extract_strided_slice %6 {offsets = [0, 896], sizes = [1, 32], strides = [1, 1]} : vector<1x2048xf32> to vector<1x32xf32>
    %120 = arith.addf %116, %119 : vector<1x32xf32>
    %121 = vector.extract_strided_slice %3 {offsets = [0, 928], sizes = [1, 32], strides = [1, 1]} : vector<1x2048xf32> to vector<1x32xf32>
    %122 = arith.addf %118, %121 : vector<1x32xf32>
    %123 = vector.extract_strided_slice %6 {offsets = [0, 928], sizes = [1, 32], strides = [1, 1]} : vector<1x2048xf32> to vector<1x32xf32>
    %124 = arith.addf %120, %123 : vector<1x32xf32>
    %125 = vector.extract_strided_slice %3 {offsets = [0, 960], sizes = [1, 32], strides = [1, 1]} : vector<1x2048xf32> to vector<1x32xf32>
    %126 = arith.addf %122, %125 : vector<1x32xf32>
    %127 = vector.extract_strided_slice %6 {offsets = [0, 960], sizes = [1, 32], strides = [1, 1]} : vector<1x2048xf32> to vector<1x32xf32>
    %128 = arith.addf %124, %127 : vector<1x32xf32>
    %129 = vector.extract_strided_slice %3 {offsets = [0, 992], sizes = [1, 32], strides = [1, 1]} : vector<1x2048xf32> to vector<1x32xf32>
    %130 = arith.addf %126, %129 : vector<1x32xf32>
    %131 = vector.extract_strided_slice %6 {offsets = [0, 992], sizes = [1, 32], strides = [1, 1]} : vector<1x2048xf32> to vector<1x32xf32>
    %132 = arith.addf %128, %131 : vector<1x32xf32>
    %133 = vector.extract_strided_slice %3 {offsets = [0, 1024], sizes = [1, 32], strides = [1, 1]} : vector<1x2048xf32> to vector<1x32xf32>
    %134 = arith.addf %130, %133 : vector<1x32xf32>
    %135 = vector.extract_strided_slice %6 {offsets = [0, 1024], sizes = [1, 32], strides = [1, 1]} : vector<1x2048xf32> to vector<1x32xf32>
    %136 = arith.addf %132, %135 : vector<1x32xf32>
    %137 = vector.extract_strided_slice %3 {offsets = [0, 1056], sizes = [1, 32], strides = [1, 1]} : vector<1x2048xf32> to vector<1x32xf32>
    %138 = arith.addf %134, %137 : vector<1x32xf32>
    %139 = vector.extract_strided_slice %6 {offsets = [0, 1056], sizes = [1, 32], strides = [1, 1]} : vector<1x2048xf32> to vector<1x32xf32>
    %140 = arith.addf %136, %139 : vector<1x32xf32>
    %141 = vector.extract_strided_slice %3 {offsets = [0, 1088], sizes = [1, 32], strides = [1, 1]} : vector<1x2048xf32> to vector<1x32xf32>
    %142 = arith.addf %138, %141 : vector<1x32xf32>
    %143 = vector.extract_strided_slice %6 {offsets = [0, 1088], sizes = [1, 32], strides = [1, 1]} : vector<1x2048xf32> to vector<1x32xf32>
    %144 = arith.addf %140, %143 : vector<1x32xf32>
    %145 = vector.extract_strided_slice %3 {offsets = [0, 1120], sizes = [1, 32], strides = [1, 1]} : vector<1x2048xf32> to vector<1x32xf32>
    %146 = arith.addf %142, %145 : vector<1x32xf32>
    %147 = vector.extract_strided_slice %6 {offsets = [0, 1120], sizes = [1, 32], strides = [1, 1]} : vector<1x2048xf32> to vector<1x32xf32>
    %148 = arith.addf %144, %147 : vector<1x32xf32>
    %149 = vector.extract_strided_slice %3 {offsets = [0, 1152], sizes = [1, 32], strides = [1, 1]} : vector<1x2048xf32> to vector<1x32xf32>
    %150 = arith.addf %146, %149 : vector<1x32xf32>
    %151 = vector.extract_strided_slice %6 {offsets = [0, 1152], sizes = [1, 32], strides = [1, 1]} : vector<1x2048xf32> to vector<1x32xf32>
    %152 = arith.addf %148, %151 : vector<1x32xf32>
    %153 = vector.extract_strided_slice %3 {offsets = [0, 1184], sizes = [1, 32], strides = [1, 1]} : vector<1x2048xf32> to vector<1x32xf32>
    %154 = arith.addf %150, %153 : vector<1x32xf32>
    %155 = vector.extract_strided_slice %6 {offsets = [0, 1184], sizes = [1, 32], strides = [1, 1]} : vector<1x2048xf32> to vector<1x32xf32>
    %156 = arith.addf %152, %155 : vector<1x32xf32>
    %157 = vector.extract_strided_slice %3 {offsets = [0, 1216], sizes = [1, 32], strides = [1, 1]} : vector<1x2048xf32> to vector<1x32xf32>
    %158 = arith.addf %154, %157 : vector<1x32xf32>
    %159 = vector.extract_strided_slice %6 {offsets = [0, 1216], sizes = [1, 32], strides = [1, 1]} : vector<1x2048xf32> to vector<1x32xf32>
    %160 = arith.addf %156, %159 : vector<1x32xf32>
    %161 = vector.extract_strided_slice %3 {offsets = [0, 1248], sizes = [1, 32], strides = [1, 1]} : vector<1x2048xf32> to vector<1x32xf32>
    %162 = arith.addf %158, %161 : vector<1x32xf32>
    %163 = vector.extract_strided_slice %6 {offsets = [0, 1248], sizes = [1, 32], strides = [1, 1]} : vector<1x2048xf32> to vector<1x32xf32>
    %164 = arith.addf %160, %163 : vector<1x32xf32>
    %165 = vector.extract_strided_slice %3 {offsets = [0, 1280], sizes = [1, 32], strides = [1, 1]} : vector<1x2048xf32> to vector<1x32xf32>
    %166 = arith.addf %162, %165 : vector<1x32xf32>
    %167 = vector.extract_strided_slice %6 {offsets = [0, 1280], sizes = [1, 32], strides = [1, 1]} : vector<1x2048xf32> to vector<1x32xf32>
    %168 = arith.addf %164, %167 : vector<1x32xf32>
    %169 = vector.extract_strided_slice %3 {offsets = [0, 1312], sizes = [1, 32], strides = [1, 1]} : vector<1x2048xf32> to vector<1x32xf32>
    %170 = arith.addf %166, %169 : vector<1x32xf32>
    %171 = vector.extract_strided_slice %6 {offsets = [0, 1312], sizes = [1, 32], strides = [1, 1]} : vector<1x2048xf32> to vector<1x32xf32>
    %172 = arith.addf %168, %171 : vector<1x32xf32>
    %173 = vector.extract_strided_slice %3 {offsets = [0, 1344], sizes = [1, 32], strides = [1, 1]} : vector<1x2048xf32> to vector<1x32xf32>
    %174 = arith.addf %170, %173 : vector<1x32xf32>
    %175 = vector.extract_strided_slice %6 {offsets = [0, 1344], sizes = [1, 32], strides = [1, 1]} : vector<1x2048xf32> to vector<1x32xf32>
    %176 = arith.addf %172, %175 : vector<1x32xf32>
    %177 = vector.extract_strided_slice %3 {offsets = [0, 1376], sizes = [1, 32], strides = [1, 1]} : vector<1x2048xf32> to vector<1x32xf32>
    %178 = arith.addf %174, %177 : vector<1x32xf32>
    %179 = vector.extract_strided_slice %6 {offsets = [0, 1376], sizes = [1, 32], strides = [1, 1]} : vector<1x2048xf32> to vector<1x32xf32>
    %180 = arith.addf %176, %179 : vector<1x32xf32>
    %181 = vector.extract_strided_slice %3 {offsets = [0, 1408], sizes = [1, 32], strides = [1, 1]} : vector<1x2048xf32> to vector<1x32xf32>
    %182 = arith.addf %178, %181 : vector<1x32xf32>
    %183 = vector.extract_strided_slice %6 {offsets = [0, 1408], sizes = [1, 32], strides = [1, 1]} : vector<1x2048xf32> to vector<1x32xf32>
    %184 = arith.addf %180, %183 : vector<1x32xf32>
    %185 = vector.extract_strided_slice %3 {offsets = [0, 1440], sizes = [1, 32], strides = [1, 1]} : vector<1x2048xf32> to vector<1x32xf32>
    %186 = arith.addf %182, %185 : vector<1x32xf32>
    %187 = vector.extract_strided_slice %6 {offsets = [0, 1440], sizes = [1, 32], strides = [1, 1]} : vector<1x2048xf32> to vector<1x32xf32>
    %188 = arith.addf %184, %187 : vector<1x32xf32>
    %189 = vector.extract_strided_slice %3 {offsets = [0, 1472], sizes = [1, 32], strides = [1, 1]} : vector<1x2048xf32> to vector<1x32xf32>
    %190 = arith.addf %186, %189 : vector<1x32xf32>
    %191 = vector.extract_strided_slice %6 {offsets = [0, 1472], sizes = [1, 32], strides = [1, 1]} : vector<1x2048xf32> to vector<1x32xf32>
    %192 = arith.addf %188, %191 : vector<1x32xf32>
    %193 = vector.extract_strided_slice %3 {offsets = [0, 1504], sizes = [1, 32], strides = [1, 1]} : vector<1x2048xf32> to vector<1x32xf32>
    %194 = arith.addf %190, %193 : vector<1x32xf32>
    %195 = vector.extract_strided_slice %6 {offsets = [0, 1504], sizes = [1, 32], strides = [1, 1]} : vector<1x2048xf32> to vector<1x32xf32>
    %196 = arith.addf %192, %195 : vector<1x32xf32>
    %197 = vector.extract_strided_slice %3 {offsets = [0, 1536], sizes = [1, 32], strides = [1, 1]} : vector<1x2048xf32> to vector<1x32xf32>
    %198 = arith.addf %194, %197 : vector<1x32xf32>
    %199 = vector.extract_strided_slice %6 {offsets = [0, 1536], sizes = [1, 32], strides = [1, 1]} : vector<1x2048xf32> to vector<1x32xf32>
    %200 = arith.addf %196, %199 : vector<1x32xf32>
    %201 = vector.extract_strided_slice %3 {offsets = [0, 1568], sizes = [1, 32], strides = [1, 1]} : vector<1x2048xf32> to vector<1x32xf32>
    %202 = arith.addf %198, %201 : vector<1x32xf32>
    %203 = vector.extract_strided_slice %6 {offsets = [0, 1568], sizes = [1, 32], strides = [1, 1]} : vector<1x2048xf32> to vector<1x32xf32>
    %204 = arith.addf %200, %203 : vector<1x32xf32>
    %205 = vector.extract_strided_slice %3 {offsets = [0, 1600], sizes = [1, 32], strides = [1, 1]} : vector<1x2048xf32> to vector<1x32xf32>
    %206 = arith.addf %202, %205 : vector<1x32xf32>
    %207 = vector.extract_strided_slice %6 {offsets = [0, 1600], sizes = [1, 32], strides = [1, 1]} : vector<1x2048xf32> to vector<1x32xf32>
    %208 = arith.addf %204, %207 : vector<1x32xf32>
    %209 = vector.extract_strided_slice %3 {offsets = [0, 1632], sizes = [1, 32], strides = [1, 1]} : vector<1x2048xf32> to vector<1x32xf32>
    %210 = arith.addf %206, %209 : vector<1x32xf32>
    %211 = vector.extract_strided_slice %6 {offsets = [0, 1632], sizes = [1, 32], strides = [1, 1]} : vector<1x2048xf32> to vector<1x32xf32>
    %212 = arith.addf %208, %211 : vector<1x32xf32>
    %213 = vector.extract_strided_slice %3 {offsets = [0, 1664], sizes = [1, 32], strides = [1, 1]} : vector<1x2048xf32> to vector<1x32xf32>
    %214 = arith.addf %210, %213 : vector<1x32xf32>
    %215 = vector.extract_strided_slice %6 {offsets = [0, 1664], sizes = [1, 32], strides = [1, 1]} : vector<1x2048xf32> to vector<1x32xf32>
    %216 = arith.addf %212, %215 : vector<1x32xf32>
    %217 = vector.extract_strided_slice %3 {offsets = [0, 1696], sizes = [1, 32], strides = [1, 1]} : vector<1x2048xf32> to vector<1x32xf32>
    %218 = arith.addf %214, %217 : vector<1x32xf32>
    %219 = vector.extract_strided_slice %6 {offsets = [0, 1696], sizes = [1, 32], strides = [1, 1]} : vector<1x2048xf32> to vector<1x32xf32>
    %220 = arith.addf %216, %219 : vector<1x32xf32>
    %221 = vector.extract_strided_slice %3 {offsets = [0, 1728], sizes = [1, 32], strides = [1, 1]} : vector<1x2048xf32> to vector<1x32xf32>
    %222 = arith.addf %218, %221 : vector<1x32xf32>
    %223 = vector.extract_strided_slice %6 {offsets = [0, 1728], sizes = [1, 32], strides = [1, 1]} : vector<1x2048xf32> to vector<1x32xf32>
    %224 = arith.addf %220, %223 : vector<1x32xf32>
    %225 = vector.extract_strided_slice %3 {offsets = [0, 1760], sizes = [1, 32], strides = [1, 1]} : vector<1x2048xf32> to vector<1x32xf32>
    %226 = arith.addf %222, %225 : vector<1x32xf32>
    %227 = vector.extract_strided_slice %6 {offsets = [0, 1760], sizes = [1, 32], strides = [1, 1]} : vector<1x2048xf32> to vector<1x32xf32>
    %228 = arith.addf %224, %227 : vector<1x32xf32>
    %229 = vector.extract_strided_slice %3 {offsets = [0, 1792], sizes = [1, 32], strides = [1, 1]} : vector<1x2048xf32> to vector<1x32xf32>
    %230 = arith.addf %226, %229 : vector<1x32xf32>
    %231 = vector.extract_strided_slice %6 {offsets = [0, 1792], sizes = [1, 32], strides = [1, 1]} : vector<1x2048xf32> to vector<1x32xf32>
    %232 = arith.addf %228, %231 : vector<1x32xf32>
    %233 = vector.extract_strided_slice %3 {offsets = [0, 1824], sizes = [1, 32], strides = [1, 1]} : vector<1x2048xf32> to vector<1x32xf32>
    %234 = arith.addf %230, %233 : vector<1x32xf32>
    %235 = vector.extract_strided_slice %6 {offsets = [0, 1824], sizes = [1, 32], strides = [1, 1]} : vector<1x2048xf32> to vector<1x32xf32>
    %236 = arith.addf %232, %235 : vector<1x32xf32>
    %237 = vector.extract_strided_slice %3 {offsets = [0, 1856], sizes = [1, 32], strides = [1, 1]} : vector<1x2048xf32> to vector<1x32xf32>
    %238 = arith.addf %234, %237 : vector<1x32xf32>
    %239 = vector.extract_strided_slice %6 {offsets = [0, 1856], sizes = [1, 32], strides = [1, 1]} : vector<1x2048xf32> to vector<1x32xf32>
    %240 = arith.addf %236, %239 : vector<1x32xf32>
    %241 = vector.extract_strided_slice %3 {offsets = [0, 1888], sizes = [1, 32], strides = [1, 1]} : vector<1x2048xf32> to vector<1x32xf32>
    %242 = arith.addf %238, %241 : vector<1x32xf32>
    %243 = vector.extract_strided_slice %6 {offsets = [0, 1888], sizes = [1, 32], strides = [1, 1]} : vector<1x2048xf32> to vector<1x32xf32>
    %244 = arith.addf %240, %243 : vector<1x32xf32>
    %245 = vector.extract_strided_slice %3 {offsets = [0, 1920], sizes = [1, 32], strides = [1, 1]} : vector<1x2048xf32> to vector<1x32xf32>
    %246 = arith.addf %242, %245 : vector<1x32xf32>
    %247 = vector.extract_strided_slice %6 {offsets = [0, 1920], sizes = [1, 32], strides = [1, 1]} : vector<1x2048xf32> to vector<1x32xf32>
    %248 = arith.addf %244, %247 : vector<1x32xf32>
    %249 = vector.extract_strided_slice %3 {offsets = [0, 1952], sizes = [1, 32], strides = [1, 1]} : vector<1x2048xf32> to vector<1x32xf32>
    %250 = arith.addf %246, %249 : vector<1x32xf32>
    %251 = vector.extract_strided_slice %6 {offsets = [0, 1952], sizes = [1, 32], strides = [1, 1]} : vector<1x2048xf32> to vector<1x32xf32>
    %252 = arith.addf %248, %251 : vector<1x32xf32>
    %253 = vector.extract_strided_slice %3 {offsets = [0, 1984], sizes = [1, 32], strides = [1, 1]} : vector<1x2048xf32> to vector<1x32xf32>
    %254 = arith.addf %250, %253 : vector<1x32xf32>
    %255 = vector.extract_strided_slice %6 {offsets = [0, 1984], sizes = [1, 32], strides = [1, 1]} : vector<1x2048xf32> to vector<1x32xf32>
    %256 = arith.addf %252, %255 : vector<1x32xf32>
    %257 = vector.extract_strided_slice %3 {offsets = [0, 2016], sizes = [1, 32], strides = [1, 1]} : vector<1x2048xf32> to vector<1x32xf32>
    %258 = arith.addf %254, %257 : vector<1x32xf32>
    %259 = vector.extract_strided_slice %6 {offsets = [0, 2016], sizes = [1, 32], strides = [1, 1]} : vector<1x2048xf32> to vector<1x32xf32>
    %260 = arith.addf %256, %259 : vector<1x32xf32>
    %cst_3 = arith.constant 2.560000e+02 : f32
    %261 = vector.broadcast %cst_3 : f32 to vector<1x32xf32>
    %262 = arith.divf %258, %261 : vector<1x32xf32>
    %cst_4 = arith.constant 2.560000e+02 : f32
    %263 = vector.broadcast %cst_4 : f32 to vector<1x32xf32>
    %264 = arith.divf %260, %263 : vector<1x32xf32>
    %265 = arith.mulf %262, %262 : vector<1x32xf32>
    %266 = arith.subf %264, %265 : vector<1x32xf32>
    %cst_5 = arith.constant 0.000000e+00 : f32
    %267 = vector.broadcast %cst_5 : f32 to vector<1x32xf32>
    %268 = arith.maximumf %266, %267 : vector<1x32xf32>
    %cst_6 = arith.constant 9.99999974E-6 : f32
    %269 = vector.broadcast %cst_6 : f32 to vector<1x32xf32>
    %270 = arith.addf %268, %269 : vector<1x32xf32>
    %271 = math.rsqrt %270 : vector<1x32xf32>
    %272 = tpu.concatenate %262, %262, %262, %262, %262, %262, %262, %262, %262, %262, %262, %262, %262, %262, %262, %262 in 1 : vector<1x32xf32>, vector<1x32xf32>, vector<1x32xf32>, vector<1x32xf32>, vector<1x32xf32>, vector<1x32xf32>, vector<1x32xf32>, vector<1x32xf32>, vector<1x32xf32>, vector<1x32xf32>, vector<1x32xf32>, vector<1x32xf32>, vector<1x32xf32>, vector<1x32xf32>, vector<1x32xf32>, vector<1x32xf32> -> vector<1x512xf32>
    %273 = tpu.concatenate %262, %262, %262, %262, %262, %262, %262, %262, %262, %262, %262, %262, %262, %262, %262, %262 in 1 : vector<1x32xf32>, vector<1x32xf32>, vector<1x32xf32>, vector<1x32xf32>, vector<1x32xf32>, vector<1x32xf32>, vector<1x32xf32>, vector<1x32xf32>, vector<1x32xf32>, vector<1x32xf32>, vector<1x32xf32>, vector<1x32xf32>, vector<1x32xf32>, vector<1x32xf32>, vector<1x32xf32>, vector<1x32xf32> -> vector<1x512xf32>
    %274 = tpu.concatenate %262, %262, %262, %262, %262, %262, %262, %262, %262, %262, %262, %262, %262, %262, %262, %262 in 1 : vector<1x32xf32>, vector<1x32xf32>, vector<1x32xf32>, vector<1x32xf32>, vector<1x32xf32>, vector<1x32xf32>, vector<1x32xf32>, vector<1x32xf32>, vector<1x32xf32>, vector<1x32xf32>, vector<1x32xf32>, vector<1x32xf32>, vector<1x32xf32>, vector<1x32xf32>, vector<1x32xf32>, vector<1x32xf32> -> vector<1x512xf32>
    %275 = tpu.concatenate %262, %262, %262, %262, %262, %262, %262, %262, %262, %262, %262, %262, %262, %262, %262, %262 in 1 : vector<1x32xf32>, vector<1x32xf32>, vector<1x32xf32>, vector<1x32xf32>, vector<1x32xf32>, vector<1x32xf32>, vector<1x32xf32>, vector<1x32xf32>, vector<1x32xf32>, vector<1x32xf32>, vector<1x32xf32>, vector<1x32xf32>, vector<1x32xf32>, vector<1x32xf32>, vector<1x32xf32>, vector<1x32xf32> -> vector<1x512xf32>
    %276 = tpu.concatenate %272, %273, %274, %275 in 1 : vector<1x512xf32>, vector<1x512xf32>, vector<1x512xf32>, vector<1x512xf32> -> vector<1x2048xf32>
    %277 = tpu.concatenate %271, %271, %271, %271, %271, %271, %271, %271, %271, %271, %271, %271, %271, %271, %271, %271 in 1 : vector<1x32xf32>, vector<1x32xf32>, vector<1x32xf32>, vector<1x32xf32>, vector<1x32xf32>, vector<1x32xf32>, vector<1x32xf32>, vector<1x32xf32>, vector<1x32xf32>, vector<1x32xf32>, vector<1x32xf32>, vector<1x32xf32>, vector<1x32xf32>, vector<1x32xf32>, vector<1x32xf32>, vector<1x32xf32> -> vector<1x512xf32>
    %278 = tpu.concatenate %271, %271, %271, %271, %271, %271, %271, %271, %271, %271, %271, %271, %271, %271, %271, %271 in 1 : vector<1x32xf32>, vector<1x32xf32>, vector<1x32xf32>, vector<1x32xf32>, vector<1x32xf32>, vector<1x32xf32>, vector<1x32xf32>, vector<1x32xf32>, vector<1x32xf32>, vector<1x32xf32>, vector<1x32xf32>, vector<1x32xf32>, vector<1x32xf32>, vector<1x32xf32>, vector<1x32xf32>, vector<1x32xf32> -> vector<1x512xf32>
    %279 = tpu.concatenate %271, %271, %271, %271, %271, %271, %271, %271, %271, %271, %271, %271, %271, %271, %271, %271 in 1 : vector<1x32xf32>, vector<1x32xf32>, vector<1x32xf32>, vector<1x32xf32>, vector<1x32xf32>, vector<1x32xf32>, vector<1x32xf32>, vector<1x32xf32>, vector<1x32xf32>, vector<1x32xf32>, vector<1x32xf32>, vector<1x32xf32>, vector<1x32xf32>, vector<1x32xf32>, vector<1x32xf32>, vector<1x32xf32> -> vector<1x512xf32>
    %280 = tpu.concatenate %271, %271, %271, %271, %271, %271, %271, %271, %271, %271, %271, %271, %271, %271, %271, %271 in 1 : vector<1x32xf32>, vector<1x32xf32>, vector<1x32xf32>, vector<1x32xf32>, vector<1x32xf32>, vector<1x32xf32>, vector<1x32xf32>, vector<1x32xf32>, vector<1x32xf32>, vector<1x32xf32>, vector<1x32xf32>, vector<1x32xf32>, vector<1x32xf32>, vector<1x32xf32>, vector<1x32xf32>, vector<1x32xf32> -> vector<1x512xf32>
    %281 = tpu.concatenate %277, %278, %279, %280 in 1 : vector<1x512xf32>, vector<1x512xf32>, vector<1x512xf32>, vector<1x512xf32> -> vector<1x2048xf32>
    %282 = vector.broadcast %276 : vector<1x2048xf32> to vector<4x2048xf32>
    %283 = arith.subf %1, %282 : vector<4x2048xf32>
    %284 = vector.broadcast %281 : vector<1x2048xf32> to vector<4x2048xf32>
    %285 = arith.mulf %283, %284 : vector<4x2048xf32>
    %c0_7 = arith.constant 0 : index
    %c0_8 = arith.constant 0 : index
    %c0_9 = arith.constant 0 : index
    %286 = vector.load %arg2[%c0_7, %c0_8, %c0_9] : memref<1x4x2048xf32, #tpu.memory_space<vmem>>, vector<1x4x2048xf32>
    %287 = vector.shape_cast %286 : vector<1x4x2048xf32> to vector<4x2048xf32>
    %288 = vector.shape_cast %285 : vector<4x2048xf32> to vector<1x4x2048xf32>
    tpu.vector_store %arg2[%c0_7, %c0_8, %c0_9], %288 {strides = array<i32>} : memref<1x4x2048xf32, #tpu.memory_space<vmem>>, vector<1x4x2048xf32>,
    return
  }
  func.func @transform_0(%arg0: i32) -> (i32, i32, i32) {
    %c0_i32 = arith.constant 0 : i32
    %c0_i32_0 = arith.constant 0 : i32
    %c0_i32_1 = arith.constant 0 : i32
    return %arg0, %c0_i32, %c0_i32_0 : i32, i32, i32
  }
  func.func @transform_1(%arg0: i32) -> (i32, i32, i32) {
    %c0_i32 = arith.constant 0 : i32
    %c0_i32_0 = arith.constant 0 : i32
    %c0_i32_1 = arith.constant 0 : i32
    return %arg0, %c0_i32, %c0_i32_0 : i32, i32, i32
  }
}

</mosaic_0001>

<bundles_post_ra>
// kernel: tpu_custom_call.1
= control target key start
LH: loop header
LB: loop body
LE: loop exit
PB: predicated region body
PF: predicated region fallthrough
CT: control target
= control target key end

     0   :  { %6 = vsyncpa [#allocation3], 0  ;;  %s1829_s0 = inlined_call_operand.hbm [shape: f32[2,4,2048], index: 0, kind: input, shape index: {}]   ;;  %s1830_s1 = inlined_call_operand.hbm [shape: f32[2,4,2048], index: 1, kind: output, shape index: {}]  }
   0x1   :  { %8 = vsyncpa [#allocation3 + $0x1], 0 }
   0x2   :  { %9 = vsyncpa [#allocation4], 0 }
   0x3   :  { %11 = vsyncpa [#allocation4 + $0x1], 0  ;;  %s1279_s6 = smov 0   ;;  %s1281_s7 = smov 0  }
   0x4   :  { %s1283_s8 = smov 0   ;;  %s1285_s9 = smov 0  }
   0x5 LB: > { %s1300_s10 = sadd.s32 4294967295, %s1263_s9   ;;  %s1097_s11 = sadd.s32 4294967294, %s1263_s9   ;;  %s1263_s9 = sphi %s1285_s9, %s1840_s9   ;;  %s1259_s8 = sphi %s1283_s8, %s1839_s8   ;;  %s1255_s7 = sphi %s1281_s7, %s1838_s7   ;;  %s1251_s6 = sphi %s1279_s6, %s1837_s6  }
   0x6   : > { %s1304_s12 = sadd.s32 1, %s1263_s9   ;;  %s24_s13 = sadd.s32 1, %s1259_s8 }
   0x7   : > { %s21_s14 = ssub.s32 %s1263_s9, %s1304_s12  ;;  %p31_p0 = scmp.ne.s32.totalorder %s1259_s8, %s1255_s7 }
   0x8   : > { %p22_p1 = scmp.eq.s32.totalorder %s21_s14, 0  ;;  %p32_p2 = scmp.eq.s32.totalorder %s1263_s9, 0 }
   0x9   : > { %p37_p3 = scmp.ne.s32.totalorder %s1255_s7, %s1251_s6  ;;  %p38_p4 = scmp.eq.s32.totalorder %s1300_s10, 0 }
   0xa   : > { %s1316_s15 = scalar_select %p22_p1, %s1259_s8, %s24_s13  }
   0xb   : > { %p1318_p5 = por %p32_p2, %p31_p0  ;;  %p1322_p6 = por %p38_p4, %p37_p3 }
   0xc   : > { %p61_p7 = scmp.eq.s32.totalorder %s1300_s10, 1  ;;  %p67_p8 = scmp.eq.s32.totalorder %s1097_s11, 1 }
   0xd   : > { %p1125_p10 = scmp.lt.s32.totalorder %s1263_s9, 2  ;;  %s87_s20 = sand.u32 1, %s1259_s8  }
   0xe   : > { %p1329_p11 = por %p61_p7, %p31_p0  ;;  %p1333_p12 = por %p67_p8, %p37_p3 }
   0xf   : > { %s1111_s21 = sshll.u32 %s1263_s9, 6  ;;  %s1100_s22 = sshll.u32 %s87_s20, 6 }
  0x10   : > { %s96_s25 = scalar_lea.hbm %s1829_s0, %s1111_s21  ;;  %s91_s27 = scalar_lea.vmem [#allocation2], %s1100_s22 }
  0x11   : > { %s98_s26 = sshll.u32 %s96_s25, 4  ;;  %s100_s28 = sshll.u32 %s91_s27, 4  ;;  %s99_s26 = int_to_ptr.hbm [resolvable:$true] %s98_s26  ;;  %s101_s28 = int_to_ptr.vmem [resolvable:$true] %s100_s28 }
  0x12   : > { %p1344_p13 = pnand %p1125_p10, %p1318_p5  ;;  %p1103_p0 = scmp.ge.s32.totalorder %s1263_s9, 1 }
  0x13   : > { %p105_p1 = scmp.lt.s32.totalorder %s1263_s9, 3  ;;  %s88_s30 = scalar_lea.sflag [#allocation3], %s87_s20 }
  0x14   : > { %s1167_s2 = sshra.s32 %s99_s26, 4  ;;  %p1171_p3 = pneg %p1344_p13  ;;  %s1168_s2 = int_to_ptr.hbm [resolvable:$true] %s1167_s2 }
  0x15   : > { %s1169_s3 = scalar_lea.hbm %s1168_s2, 64  ;;  %s1174_s11 = scalar_lea.hbm %s1829_s0, 128 }
  0x16   : > { %p1170_p2 = scmp.ne.s32.totalorder %s1168_s2, %s1169_s3  ;;  %p1175_p5 = scmp.lt.s32.totalorder %s1168_s2, %s1829_s0 }
  0x17   : > { %p1176_p8 = scmp.lt.s32.totalorder %s1174_s11, %s1169_s3 }
  0x18   : > { %p1172_p4 = pnand %p1171_p3, %p1170_p2 }
  0x19   : > { %p1177_p10 = por %p1176_p8, %p1175_p5 }
  0x1a   : > { %p1173_p7 = pneg %p1172_p4 }
  0x1c   : > { %p1178_p9 = pnand %p1177_p10, %p1173_p7 }
  0x1e   : > { %1181 = shalt.err (!%p1178_p9)
}
  0x1f   : > { %1120 = dma.hbm_to_vmem [thread:$0]  (!%p1344_p13), %s99_s26, 1024, %s101_s28, %s88_s30  }
  0x20   : > { %p106_p2 = pnand %p1103_p0, %p105_p1 }
  0x21   : > { %s1365_s16 = sand.u32 (!%p106_p2), 1, %s1255_s7  }
  0x22   : > { %109 = sbr.rel (%p106_p2) target bundleno = 591 (0x24f), region = 24  ;;  %s1104_s20 = sshll.u32 (!%p106_p2), %s1365_s16, 6 }
  0x23   : > { %s112_s21 = scalar_lea.sflag (!%p106_p2), [#allocation3], %s1365_s16  ;;  %s1371_s22 = scalar_lea.vmem (!%p106_p2), [#allocation2], %s1104_s20 }
  0x27   : > { %1242 = dma.done.wait (%p1322_p6), %s112_s21, 1024  }
  0x28   : > { %1244 = vsyncadd (%p1322_p6), %s112_s21, 4294966272  ;;  %v1378_v0 = vld [vmem:[%s1371_s22] sm:$0xff]  ;;  %v1381_v1 = vld [vmem:[%s1371_s22 + $0x8] sm:$0xff]  ;;  %vm194_vm0 = vcmask 1043456   ;;  %s1265_s17 = smov 64   ;;  %s1266_s23 = smov 96  }
  0x29   : > { %151 = vst [vmem:[#allocation1] ss:$2 sm:$0xff] %v1378_v0  ;;  %v1386_v2 = vld [vmem:[%s1371_s22 + $0x20] sm:$0xff]  ;;  %v1392_v7 = vld [vmem:[%s1371_s22 + $0x28] sm:$0xff]  ;;  %v307_v15 = vmul.f32 %v1378_v0, %v1378_v0  ;;  %v308_v22 = vmul.f32 %v1381_v1, %v1381_v1  ;;  %v1407_v23 = vld [vmem:[%s1371_s22 + $0x10] sm:$0xff]  ;;  %s1267_s24 = smov 32  }
  0x2a   : > { %153 = vst [vmem:[#allocation1 + $0x10] ss:$2 sm:$0xff] %v1381_v1  ;;  %v311_v30 = vmul.f32 %v1386_v2, %v1386_v2  ;;  %v312_v33 = vmul.f32 %v1392_v7, %v1392_v7  ;;  %v1431_v41 = vld [vmem:[%s1371_s22 + $0x30] sm:$0xff]  ;;  %v309_v54 = vmul.f32 %v1407_v23, %v1407_v23  ;;  %vm957_vm5 = vcmask 261120   ;;  %s1112_s25 = sshll.u32 %s1300_s10, 6  ;;  %s134_s10 = scalar_lea.vmem [#allocation5], %s1104_s20 }
  0x2b   : > { %155 = vst [vmem:[#allocation1 + $0x20] ss:$2 sm:$0xff] %v1407_v23  ;;  %vm959_vm6 = vcmask 523264   ;;  %vm961_vm7 = vcmask 785408   ;;  %s1022_s28 = scalar_lea.hbm %s1830_s1, %s1112_s25  ;;  %s1024_s29 = sshll.u32 %s134_s10, 4  ;;  %s1025_s29 = int_to_ptr.vmem [resolvable:$true] %s1024_s29 }
  0x2c   : > { %s1026_s30 = sshll.u32 %s1022_s28, 4  ;;  %s1011_s2 = scalar_lea.sflag [#allocation4], %s1365_s16  ;;  %s1027_s30 = int_to_ptr.hbm [resolvable:$true] %s1026_s30 }
  0x2d   : > { %s1211_s3 = sshra.s32 %s1027_s30, 4  ;;  %s1217_s13 = scalar_lea.hbm %s1830_s1, 128  ;;  %s1212_s3 = int_to_ptr.hbm [resolvable:$true] %s1211_s3 }
  0x2e   : > { %s1213_s4 = scalar_lea.hbm %s1212_s3, 64  ;;  %p1218_p0 = scmp.lt.s32.totalorder %s1212_s3, %s1830_s1 }
  0x2f   : > { %p1214_p6 = scmp.ne.s32.totalorder %s1212_s3, %s1213_s4  ;;  %p1219_p1 = scmp.lt.s32.totalorder %s1217_s13, %s1213_s4 }
  0x30   : > { %v158_v3 = vld.sshfl [vmem:[#allocation1] sm:$0xff pattern:$0x75316420]  ;;  %v159_v4 = vld.sshfl [vmem:[#allocation1 + $0x8] sm:$0xff pattern:$0x75316420] }
  0x31   : > { %v195_v5 = vsel %vm194_vm0, %v158_v3, 0.0  ;;  %v202_v6 = vsel %vm194_vm0, %v159_v4, 0.0  ;;  %166 = vst [vmem:[#allocation1] ss:$2 sm:$0xff] %v1386_v2  ;;  %p1215_p9 = pnand %p1214_p6, %p1329_p11  ;;  %p1220_p3 = por %p1219_p1, %p1218_p0 }
  0x32   : > { %v196_v8 = vrot.slane %v195_v5, 4  ;;  %v203_v9 = vrot.slane %v202_v6, 4  ;;  %v160_v10 = vld.sshfl [vmem:[#allocation1 + $0x10] sm:$0xff pattern:$0x75316420] }
  0x33   : > { %v1394_v11 = vld.sshfl [vmem:[#allocation1 + $0x18] sm:$0xff pattern:$0x75316420]  ;;  %v209_v12 = vsel %vm194_vm0, %v160_v10, 0.0  ;;  %p1216_p13 = pneg %p1215_p9 }
  0x34   : > { %v197_v13 = vadd.f32 %v196_v8, %v195_v5  ;;  %v204_v14 = vadd.f32 %v203_v9, %v202_v6  ;;  %167 = vst [vmem:[#allocation1 + $0x10] ss:$2 sm:$0xff] %v1392_v7  ;;  %v210_v18 = vrot.slane %v209_v12, 4  ;;  %v162_v42 = vld.sshfl [vmem:[#allocation1 + $0x20] sm:$0xff pattern:$0x75316420] }
  0x35   : > { %v1433_v46 = vld.sshfl [vmem:[#allocation1 + $0x28] sm:$0xff pattern:$0x75316420]  ;;  %v216_v3 = vsel %vm194_vm0, %v1394_v11, 0.0  ;;  %v1469_v9 = vld [vmem:[%s1371_s22 + $0x18] sm:$0xff]  ;;  %p1221_p4 = pnand %p1220_p3, %p1216_p13 }
  0x36   : > { %v198_v16 = vrot.slane %v197_v13, 2  ;;  %v205_v17 = vrot.slane %v204_v14, 2  ;;  %v211_v26 = vadd.f32 %v210_v18, %v209_v12  ;;  %168 = vst [vmem:[#allocation1 + $0x20] ss:$2 sm:$0xff] %v1431_v41  ;;  %v217_v8 = vrot.slane %v216_v3, 4 }
  0x37   : > { %157 = vst [vmem:[#allocation1 + $0x30] ss:$2 sm:$0xff] %v1469_v9 }
  0x38   : > { %v199_v19 = vadd.f32 %v198_v16, %v197_v13  ;;  %v1400_v20 = vld.sshfl [vmem:[#allocation1] sm:$0xff pattern:$0x75316420]  ;;  %v1402_v21 = vld.sshfl [vmem:[#allocation1 + $0x8] sm:$0xff pattern:$0x75316420]  ;;  %v206_v25 = vadd.f32 %v205_v17, %v204_v14  ;;  %v218_v13 = vadd.f32 %v217_v8, %v216_v3  ;;  %v313_v14 = vmul.f32 %v1431_v41, %v1431_v41 }
  0x39   : > { %323 = vst [vmem:[#allocation1] ss:$2 sm:$0xff] %v307_v15  ;;  %v212_v32 = vrot.slane %v211_v26, 2 }
  0x3a   : > { %v200_v24 = vrot.slane %v199_v19, 1  ;;  %v207_v31 = vrot.slane %v206_v25, 1  ;;  %v219_v17 = vrot.slane %v218_v13, 2 }
  0x3b   : > { %v1410_v27 = vld.sshfl [vmem:[#allocation1 + $0x10] sm:$0xff pattern:$0x75316420]  ;;  %v1412_v28 = vld.sshfl [vmem:[#allocation1 + $0x18] sm:$0xff pattern:$0x75316420]  ;;  %v213_v38 = vadd.f32 %v212_v32, %v211_v26 }
  0x3c   : > { %v1414_v29 = vadd.f32 %v200_v24, %v199_v19  ;;  %325 = vst [vmem:[#allocation1 + $0x10] ss:$2 sm:$0xff] %v308_v22  ;;  %v1427_v37 = vadd.f32 %v207_v31, %v206_v25  ;;  %v1483_v22 = vld [vmem:[%s1371_s22 + $0x38] sm:$0xff]  ;;  %v220_v26 = vadd.f32 %v219_v17, %v218_v13  ;;  %v223_v32 = vsel %vm194_vm0, %v162_v42, 0.0 }
  0x3d   : > { %v214_v47 = vrot.slane %v213_v38, 1  ;;  %v1447_v55 = vld.sshfl [vmem:[#allocation1 + $0x20] sm:$0xff pattern:$0x75316420] }
  0x3e   : > { %488 = vrot.lane.b32.xlu1 %v1414_v29, %s1265_s17  ;;  %479 = vrot.lane.b32.xlu0 %v1414_v29, %s1266_s23  ;;  %v1453_v59 = vld.sshfl [vmem:[#allocation1 + $0x28] sm:$0xff pattern:$0x75316420] }
  0x3f   : > { %496 = vrot.lane.b32.xlu2 %v1414_v29, %s1267_s24  ;;  %v1442_v50 = vadd.f32 %v214_v47, %v213_v38  ;;  %327 = vst [vmem:[#allocation1 + $0x20] ss:$2 sm:$0xff] %v309_v54  ;;  %v224_v38 = vrot.slane %v223_v32, 4  ;;  %v230_v54 = vsel %vm194_vm0, %v1433_v46, 0.0  ;;  %v314_v46 = vmul.f32 %v1483_v22, %v1483_v22 }
  0x40   : > { %v330_v34 = vld.sshfl [vmem:[#allocation1] sm:$0xff pattern:$0x75316420]  ;;  %v331_v35 = vld.sshfl [vmem:[#allocation1 + $0x8] sm:$0xff pattern:$0x75316420] }
  0x41   : > { %v366_v36 = vsel %vm194_vm0, %v330_v34, 0.0  ;;  %338 = vst [vmem:[#allocation1] ss:$2 sm:$0xff] %v311_v30  ;;  %v373_v40 = vsel %vm194_vm0, %v331_v35, 0.0  ;;  %v221_v35 = vrot.slane %v220_v26, 1 }
  0x42   : > { %v367_v39 = vrot.slane %v366_v36, 4  ;;  %v374_v49 = vrot.slane %v373_v40, 4  ;;  %v164_v30 = vld.sshfl [vmem:[#allocation1 + $0x30] sm:$0xff pattern:$0x75316420] }
  0x43   : > { %v332_v43 = vld.sshfl [vmem:[#allocation1 + $0x10] sm:$0xff pattern:$0x75316420]  ;;  %v333_v44 = vld.sshfl [vmem:[#allocation1 + $0x18] sm:$0xff pattern:$0x75316420]  ;;  %v1502_v42 = vadd.f32 %v221_v35, %v220_v26 }
  0x44   : > { %v368_v45 = vadd.f32 %v367_v39, %v366_v36  ;;  %339 = vst [vmem:[#allocation1 + $0x10] ss:$2 sm:$0xff] %v312_v33  ;;  %v375_v52 = vadd.f32 %v374_v49, %v373_v40  ;;  %v380_v53 = vsel %vm194_vm0, %v332_v43, 0.0  ;;  %v387_v63 = vsel %vm194_vm0, %v333_v44, 0.0 }
  0x45   : > { %v381_v58 = vrot.slane %v380_v53, 4  ;;  %v388_v6 = vrot.slane %v387_v63, 4  ;;  %v1489_v33 = vld.sshfl [vmem:[#allocation1 + $0x38] sm:$0xff pattern:$0x75316420]  ;;  %v310_v39 = vmul.f32 %v1469_v9, %v1469_v9  ;;  %v225_v44 = vadd.f32 %v224_v38, %v223_v32 }
  0x46   : > { %524 = vrot.lane.b32.xlu1 %v1427_v37, %s1267_s24  ;;  %507 = vrot.lane.b32.xlu0 %v1427_v37, %s1266_s23  ;;  %v369_v48 = vrot.slane %v368_v45, 2  ;;  %v376_v57 = vrot.slane %v375_v52, 2  ;;  %v334_v18 = vld.sshfl [vmem:[#allocation1 + $0x20] sm:$0xff pattern:$0x75316420] }
  0x47   : > { %516 = vrot.lane.b32.xlu2 %v1427_v37, %s1265_s17  ;;  %v382_v62 = vadd.f32 %v381_v58, %v380_v53  ;;  %v389_v12 = vadd.f32 %v388_v6, %v387_v63  ;;  %v335_v19 = vld.sshfl [vmem:[#allocation1 + $0x28] sm:$0xff pattern:$0x75316420]  ;;  %v394_v31 = vsel %vm194_vm0, %v334_v18, 0.0  ;;  %169 = vst [vmem:[#allocation1 + $0x30] ss:$2 sm:$0xff] %v1483_v22 }
  0x48   : > { %v370_v51 = vadd.f32 %v369_v48, %v368_v45  ;;  %v377_v61 = vadd.f32 %v376_v57, %v375_v52  ;;  %340 = vst [vmem:[#allocation1 + $0x20] ss:$2 sm:$0xff] %v313_v14  ;;  %v395_v36 = vrot.slane %v394_v31, 4  ;;  %v226_v49 = vrot.slane %v225_v44, 2 }
  0x49   : > { %v383_v5 = vrot.slane %v382_v62, 2  ;;  %v390_v16 = vrot.slane %v389_v12, 2  ;;  %v401_v53 = vsel %vm194_vm0, %v335_v19, 0.0 }
  0x4a   : > { %v371_v56 = vrot.slane %v370_v51, 1  ;;  %v378_v4 = vrot.slane %v377_v61, 1  ;;  %v396_v43 = vadd.f32 %v395_v36, %v394_v31  ;;  %v227_v52 = vadd.f32 %v226_v49, %v225_v44 }
  0x4b   : > { %v384_v11 = vadd.f32 %v383_v5, %v382_v62  ;;  %v391_v25 = vadd.f32 %v390_v16, %v389_v12  ;;  %v402_v58 = vrot.slane %v401_v53, 4 }
  0x4c   : > { %v1457_v60 = vadd.f32 %v371_v56, %v370_v51  ;;  %v1472_v10 = vadd.f32 %v378_v4, %v377_v61  ;;  %v397_v48 = vrot.slane %v396_v43, 2  ;;  %v228_v57 = vrot.slane %v227_v52, 1 }
  0x4d   : > { %v385_v15 = vrot.slane %v384_v11, 1  ;;  %v392_v34 = vrot.slane %v391_v25, 1  ;;  %v231_v61 = vrot.slane %v230_v54, 4  ;;  %v403_v3 = vadd.f32 %v402_v58, %v401_v53  ;;  %v342_v58 = vld.sshfl [vmem:[#allocation1] sm:$0xff pattern:$0x75316420] }
  0x4e   : > { %552 = vrot.lane.b32.xlu1 %v1442_v50, %s1267_s24  ;;  %535 = vrot.lane.b32.xlu0 %v1442_v50, %s1266_s23  ;;  %v1504_v45 = vld.sshfl [vmem:[#allocation1 + $0x30] sm:$0xff pattern:$0x75316420]  ;;  %v1506_v47 = vld.sshfl [vmem:[#allocation1 + $0x38] sm:$0xff pattern:$0x75316420]  ;;  %v398_v51 = vadd.f32 %v397_v48, %v396_v43  ;;  %v1525_v63 = vadd.f32 %v228_v57, %v227_v52 }
  0x4f   : > { %544 = vrot.lane.b32.xlu2 %v1442_v50, %s1265_s17  ;;  %v1485_v24 = vadd.f32 %v385_v15, %v384_v11  ;;  %v1500_v40 = vadd.f32 %v392_v34, %v391_v25  ;;  %329 = vst [vmem:[#allocation1 + $0x30] ss:$2 sm:$0xff] %v310_v39  ;;  %v232_v4 = vadd.f32 %v231_v61, %v230_v54  ;;  %v404_v5 = vrot.slane %v403_v3, 2 }
  0x50   : > { %v399_v56 = vrot.slane %v398_v51, 1  ;;  %v237_v15 = vsel %vm194_vm0, %v164_v30, 0.0  ;;  %v244_v39 = vsel %vm194_vm0, %v1489_v33, 0.0 }
  0x51   : > { %v233_v6 = vrot.slane %v232_v4, 2  ;;  %v405_v12 = vadd.f32 %v404_v5, %v403_v3  ;;  %v238_v19 = vrot.slane %v237_v15, 4  ;;  %v245_v49 = vrot.slane %v244_v39, 4 }
  0x52   : > { %v1523_v62 = vadd.f32 %v399_v56, %v398_v51  ;;  %v251_v5 = vsel %vm194_vm0, %v1400_v20, 0.0 }
  0x53   : > { %v234_v13 = vadd.f32 %v233_v6, %v232_v4  ;;  %v406_v16 = vrot.slane %v405_v12, 1  ;;  %v239_v32 = vadd.f32 %v238_v19, %v237_v15  ;;  %v246_v33 = vadd.f32 %v245_v49, %v244_v39 }
  0x55   : > { %v235_v17 = vrot.slane %v234_v13, 1  ;;  %v1543_v25 = vadd.f32 %v406_v16, %v405_v12  ;;  %v240_v34 = vrot.slane %v239_v32, 2  ;;  %v247_v57 = vrot.slane %v246_v33, 2 }
  0x56   : > { %492 = vrot.lane.b32.xlu1 %v1457_v60, %s1265_s17  ;;  %484 = vrot.lane.b32.xlu0 %v1457_v60, %s1266_s23  ;;  %v336_v8 = vld.sshfl [vmem:[#allocation1 + $0x30] sm:$0xff pattern:$0x75316420]  ;;  %v337_v11 = vld.sshfl [vmem:[#allocation1 + $0x38] sm:$0xff pattern:$0x75316420] }
  0x57   : > { %500 = vrot.lane.b32.xlu2 %v1457_v60, %s1267_s24  ;;  %341 = vst [vmem:[#allocation1 + $0x30] ss:$2 sm:$0xff] %v314_v46  ;;  %v408_v14 = vsel %vm194_vm0, %v336_v8, 0.0  ;;  %v1545_v26 = vadd.f32 %v235_v17, %v234_v13  ;;  %v241_v36 = vadd.f32 %v240_v34, %v239_v32  ;;  %v415_v38 = vsel %vm194_vm0, %v337_v11, 0.0 }
  0x58   : > { %v409_v18 = vrot.slane %v408_v14, 4  ;;  %v416_v48 = vrot.slane %v415_v38, 4  ;;  %v248_v4 = vadd.f32 %v247_v57, %v246_v33  ;;  %v422_v46 = vsel %vm194_vm0, %v342_v58, 0.0  ;;  %v343_v32 = vld.sshfl [vmem:[#allocation1 + $0x8] sm:$0xff pattern:$0x75316420] }
  0x59   : > { %v242_v44 = vrot.slane %v241_v36, 1  ;;  %v423_v11 = vrot.slane %v422_v46, 4  ;;  %v252_v12 = vrot.slane %v251_v5, 4  ;;  %v429_v39 = vsel %vm194_vm0, %v343_v32, 0.0 }
  0x5a   : > { %v410_v31 = vadd.f32 %v409_v18, %v408_v14  ;;  %v417_v54 = vadd.f32 %v416_v48, %v415_v38  ;;  %v249_v8 = vrot.slane %v248_v4, 1 }
  0x5b   : > { %v1564_v53 = vadd.f32 %v242_v44, %v241_v36  ;;  %v424_v16 = vadd.f32 %v423_v11, %v422_v46  ;;  %v253_v20 = vadd.f32 %v252_v12, %v251_v5 }
  0x5c   : > { %v411_v30 = vrot.slane %v410_v31, 2  ;;  %v418_v56 = vrot.slane %v417_v54, 2  ;;  %v1583_v15 = vadd.f32 %v249_v8, %v248_v4 }
  0x5d   : > { %v425_v17 = vrot.slane %v424_v16, 2  ;;  %v254_v18 = vrot.slane %v253_v20, 2 }
  0x5e   : > { %512 = vrot.lane.b32.xlu1 %v1472_v10, %s1266_s23  ;;  %520 = vrot.lane.b32.xlu0 %v1472_v10, %s1265_s17  ;;  %v412_v35 = vadd.f32 %v411_v30, %v410_v31  ;;  %v419_v3 = vadd.f32 %v418_v56, %v417_v54  ;;  %v430_v54 = vrot.slane %v429_v39, 4 }
  0x5f   : > { %528 = vrot.lane.b32.xlu2 %v1472_v10, %s1267_s24  ;;  %v255_v36 = vadd.f32 %v254_v18, %v253_v20  ;;  %v344_v20 = vld.sshfl [vmem:[#allocation1 + $0x10] sm:$0xff pattern:$0x75316420] }
  0x60   : > { %v413_v43 = vrot.slane %v412_v35, 1  ;;  %v420_v6 = vrot.slane %v419_v3, 1  ;;  %v431_v4 = vadd.f32 %v430_v54, %v429_v39  ;;  %v436_v32 = vsel %vm194_vm0, %v344_v20, 0.0 }
  0x61   : > { %v256_v49 = vrot.slane %v255_v36, 1 }
  0x62   : > { %v1562_v52 = vadd.f32 %v413_v43, %v412_v35  ;;  %v1581_v14 = vadd.f32 %v420_v6, %v419_v3  ;;  %v426_v35 = vadd.f32 %v425_v17, %v424_v16  ;;  %v258_v43 = vsel %vm194_vm0, %v1402_v21, 0.0 }
  0x63   : > { %v1604_v3 = vadd.f32 %v256_v49, %v255_v36 }
  0x64   : > { %v427_v48 = vrot.slane %v426_v35, 1 }
  0x66   : > { %540 = vrot.lane.b32.xlu1 %v1485_v24, %s1266_s23  ;;  %548 = vrot.lane.b32.xlu0 %v1485_v24, %s1265_s17 }
  0x67   : > { %556 = vrot.lane.b32.xlu2 %v1485_v24, %s1267_s24 }
  0x6e   : > { %568 = vrot.lane.b32.xlu1 %v1500_v40, %s1266_s23  ;;  %563 = vrot.lane.b32.xlu0 %v1502_v42, %s1266_s23 }
  0x6f   : > { %572 = vrot.lane.b32.xlu2 %v1502_v42, %s1265_s17 }
  0x76   : > { %580 = vrot.lane.b32.xlu1 %v1502_v42, %s1267_s24  ;;  %576 = vrot.lane.b32.xlu0 %v1500_v40, %s1265_s17 }
  0x77   : > { %584 = vrot.lane.b32.xlu2 %v1500_v40, %s1267_s24 }
  0x7e   : > { %596 = vrot.lane.b32.xlu1 %v1523_v62, %s1266_s23  ;;  %591 = vrot.lane.b32.xlu0 %v1525_v63, %s1266_s23 }
  0x7f   : > { %600 = vrot.lane.b32.xlu2 %v1525_v63, %s1265_s17 }
  0x86   : > { %608 = vrot.lane.b32.xlu1 %v1525_v63, %s1267_s24  ;;  %604 = vrot.lane.b32.xlu0 %v1523_v62, %s1265_s17 }
  0x87   : > { %612 = vrot.lane.b32.xlu2 %v1523_v62, %s1267_s24 }
  0x8e   : > { %624 = vrot.lane.b32.xlu1 %v1543_v25, %s1266_s23  ;;  %619 = vrot.lane.b32.xlu0 %v1545_v26, %s1266_s23 }
  0x8f   : > { %628 = vrot.lane.b32.xlu2 %v1545_v26, %s1265_s17 }
  0x96   : > { %636 = vrot.lane.b32.xlu1 %v1545_v26, %s1267_s24  ;;  %632 = vrot.lane.b32.xlu0 %v1543_v25, %s1265_s17 }
  0x97   : > { %640 = vrot.lane.b32.xlu2 %v1543_v25, %s1267_s24 }
  0x99   : > { %v497_v51 = vpop.permute.xlu2 %496 }
  0x9e   : > { %652 = vrot.lane.b32.xlu1 %v1562_v52, %s1266_s23  ;;  %647 = vrot.lane.b32.xlu0 %v1564_v53, %s1266_s23 }
  0x9f   : > { %656 = vrot.lane.b32.xlu2 %v1564_v53, %s1265_s17 }
  0xa1   : > { %v517_v61 = vpop.permute.xlu2 %516 }
  0xa6   : > { %664 = vrot.lane.b32.xlu1 %v1564_v53, %s1267_s24  ;;  %660 = vrot.lane.b32.xlu0 %v1562_v52, %s1265_s17 }
  0xa7   : > { %668 = vrot.lane.b32.xlu2 %v1562_v52, %s1267_s24 }
  0xa9   : > { %v545_v13 = vpop.permute.xlu2 %544 }
  0xae   : > { %680 = vrot.lane.b32.xlu1 %v1581_v14, %s1266_s23  ;;  %675 = vrot.lane.b32.xlu0 %v1583_v15, %s1266_s23 }
  0xaf   : > { %684 = vrot.lane.b32.xlu2 %v1583_v15, %s1265_s17 }
  0xb0   : > { %v489_v19 = vpop.permute.xlu1 %488  ;;  %v480_v31 = vpop.permute.xlu0 %479 }
  0xb1   : > { %v482_v30 = vadd.f32 %v480_v31, %v1414_v29  ;;  %v501_v34 = vpop.permute.xlu2 %500  ;;  %v259_v29 = vrot.slane %v258_v43, 4 }
  0xb3   : > { %v491_v38 = vadd.f32 %v489_v19, %v482_v30  ;;  %v260_v46 = vadd.f32 %v259_v29, %v258_v43  ;;  %v265_v30 = vsel %vm194_vm0, %v1410_v27, 0.0 }
  0xb4   : > { %v266_v39 = vrot.slane %v265_v30, 4 }
  0xb5   : > { %v499_v44 = vadd.f32 %v497_v51, %v491_v38  ;;  %v1602_v51 = vadd.f32 %v427_v48, %v426_v35  ;;  %v261_v8 = vrot.slane %v260_v46, 2  ;;  %v437_v38 = vrot.slane %v436_v32, 4 }
  0xb6   : > { %692 = vrot.lane.b32.xlu1 %v1583_v15, %s1267_s24  ;;  %688 = vrot.lane.b32.xlu0 %v1581_v14, %s1265_s17  ;;  %v267_v29 = vadd.f32 %v266_v39, %v265_v30 }
  0xb7   : > { %v504_v33 = vadd.f32 %v499_v44, %v1427_v37  ;;  %696 = vrot.lane.b32.xlu2 %v1581_v14, %s1267_s24  ;;  %v432_v37 = vrot.slane %v431_v4, 2  ;;  %v262_v19 = vadd.f32 %v261_v8, %v260_v46  ;;  %v438_v54 = vadd.f32 %v437_v38, %v436_v32 }
  0xb8   : > { %v525_v56 = vpop.permute.xlu1 %524  ;;  %v508_v57 = vpop.permute.xlu0 %507 }
  0xb9   : > { %v510_v58 = vadd.f32 %v508_v57, %v504_v33  ;;  %v529_v21 = vpop.permute.xlu2 %528  ;;  %v263_v36 = vrot.slane %v262_v19, 1  ;;  %v439_v57 = vrot.slane %v438_v54, 2 }
  0xbb   : > { %v519_v5 = vadd.f32 %v517_v61, %v510_v58  ;;  %v433_v61 = vadd.f32 %v432_v37, %v431_v4  ;;  %v1625_v49 = vadd.f32 %v263_v36, %v262_v19  ;;  %v268_v58 = vrot.slane %v267_v29, 2 }
  0xbc   : > { %v440_v8 = vadd.f32 %v439_v57, %v438_v54  ;;  %v346_v57 = vld.sshfl [vmem:[#allocation1 + $0x20] sm:$0xff pattern:$0x75316420] }
  0xbd   : > { %v527_v6 = vadd.f32 %v525_v56, %v519_v5  ;;  %v345_v5 = vld.sshfl [vmem:[#allocation1 + $0x18] sm:$0xff pattern:$0x75316420] }
  0xbe   : > { %708 = vrot.lane.b32.xlu1 %v1602_v51, %s1266_s23  ;;  %703 = vrot.lane.b32.xlu0 %v1604_v3, %s1266_s23 }
  0xbf   : > { %v532_v11 = vadd.f32 %v527_v6, %v1442_v50  ;;  %712 = vrot.lane.b32.xlu2 %v1604_v3, %s1265_s17  ;;  %v434_v50 = vrot.slane %v433_v61, 1 }
  0xc0   : > { %v553_v12 = vpop.permute.xlu1 %552  ;;  %v536_v16 = vpop.permute.xlu0 %535 }
  0xc1   : > { %v538_v17 = vadd.f32 %v536_v16, %v532_v11  ;;  %v557_v18 = vpop.permute.xlu2 %556  ;;  %v1623_v27 = vadd.f32 %v434_v50, %v433_v61  ;;  %v272_v16 = vsel %vm194_vm0, %v1412_v28, 0.0 }
  0xc2   : > { %v273_v19 = vrot.slane %v272_v16, 4 }
  0xc3   : > { %v547_v31 = vadd.f32 %v545_v13, %v538_v17 }
  0xc4   : > { %v274_v39 = vadd.f32 %v273_v19, %v272_v16 }
  0xc5   : > { %v555_v35 = vadd.f32 %v553_v12, %v547_v31  ;;  %v443_v12 = vsel %vm194_vm0, %v345_v5, 0.0 }
  0xc6   : > { %720 = vrot.lane.b32.xlu1 %v1604_v3, %s1267_s24  ;;  %716 = vrot.lane.b32.xlu0 %v1602_v51, %s1265_s17  ;;  %v444_v61 = vrot.slane %v443_v12, 4 }
  0xc7   : > { %724 = vrot.lane.b32.xlu2 %v1602_v51, %s1267_s24  ;;  %v560_v54 = vadd.f32 %v555_v35, %v1502_v42 }
  0xc8   : > { %v493_v13 = vpop.permute.xlu1 %492  ;;  %v485_v43 = vpop.permute.xlu0 %484  ;;  %v445_v38 = vadd.f32 %v444_v61, %v443_v12 }
  0xc9   : > { %v487_v44 = vadd.f32 %v485_v43, %v1457_v60  ;;  %v573_v48 = vpop.permute.xlu2 %572 }
  0xcb   : > { %v495_v33 = vadd.f32 %v493_v13, %v487_v44  ;;  %v275_v44 = vrot.slane %v274_v39, 2 }
  0xcd   : > { %v503_v56 = vadd.f32 %v501_v34, %v495_v33  ;;  %v269_v34 = vadd.f32 %v268_v58, %v267_v29 }
  0xce   : > { %736 = vrot.lane.b32.xlu1 %v1623_v27, %s1266_s23  ;;  %731 = vrot.lane.b32.xlu0 %v1625_v49, %s1266_s23 }
  0xcf   : > { %v505_v4 = vadd.f32 %v503_v56, %v1472_v10  ;;  %740 = vrot.lane.b32.xlu2 %v1625_v49, %s1265_s17  ;;  %v441_v10 = vrot.slane %v440_v8, 1  ;;  %v270_v17 = vrot.slane %v269_v34, 1 }
  0xd0   : > { %v513_v60 = vpop.permute.xlu1 %512  ;;  %v521_v46 = vpop.permute.xlu0 %520 }
  0xd1   : > { %v515_v6 = vadd.f32 %v513_v60, %v505_v4  ;;  %v585_v37 = vpop.permute.xlu2 %584  ;;  %v1646_v36 = vadd.f32 %v270_v17, %v269_v34 }
  0xd3   : > { %v523_v11 = vadd.f32 %v521_v46, %v515_v6  ;;  %v276_v46 = vadd.f32 %v275_v44, %v274_v39  ;;  %v450_v6 = vsel %vm194_vm0, %v346_v57, 0.0 }
  0xd4   : > { %v451_v35 = vrot.slane %v450_v6, 4 }
  0xd5   : > { %v531_v20 = vadd.f32 %v529_v21, %v523_v11  ;;  %v1644_v21 = vadd.f32 %v441_v10, %v440_v8  ;;  %v279_v8 = vsel %vm194_vm0, %v1447_v55, 0.0  ;;  %v277_v42 = vrot.slane %v276_v46, 1 }
  0xd6   : > { %748 = vrot.lane.b32.xlu1 %v1625_v49, %s1267_s24  ;;  %744 = vrot.lane.b32.xlu0 %v1623_v27, %s1265_s17  ;;  %v280_v34 = vrot.slane %v279_v8, 4  ;;  %v452_v17 = vadd.f32 %v451_v35, %v450_v6 }
  0xd7   : > { %v533_v31 = vadd.f32 %v531_v20, %v1485_v24  ;;  %752 = vrot.lane.b32.xlu2 %v1623_v27, %s1267_s24  ;;  %v446_v24 = vrot.slane %v445_v38, 2  ;;  %v1667_v55 = vadd.f32 %v277_v42, %v276_v46 }
  0xd8   : > { %v541_v32 = vpop.permute.xlu1 %540  ;;  %v549_v30 = vpop.permute.xlu0 %548  ;;  %v281_v61 = vadd.f32 %v280_v34, %v279_v8 }
  0xd9   : > { %v543_v50 = vadd.f32 %v541_v32, %v533_v31  ;;  %v601_v28 = vpop.permute.xlu2 %600  ;;  %v447_v60 = vadd.f32 %v446_v24, %v445_v38  ;;  %v453_v31 = vrot.slane %v452_v17, 2 }
  0xda   : > { %v282_v32 = vrot.slane %v281_v61, 2 }
  0xdb   : > { %v551_v13 = vadd.f32 %v549_v30, %v543_v50  ;;  %v454_v44 = vadd.f32 %v453_v31, %v452_v17  ;;  %v348_v17 = vld.sshfl [vmem:[#allocation1 + $0x30] sm:$0xff pattern:$0x75316420] }
  0xdd   : > { %v559_v43 = vadd.f32 %v557_v18, %v551_v13  ;;  %v347_v13 = vld.sshfl [vmem:[#allocation1 + $0x28] sm:$0xff pattern:$0x75316420] }
  0xde   : > { %764 = vrot.lane.b32.xlu1 %v1644_v21, %s1266_s23  ;;  %759 = vrot.lane.b32.xlu0 %v1646_v36, %s1266_s23 }
  0xdf   : > { %v561_v29 = vadd.f32 %v559_v43, %v1500_v40  ;;  %768 = vrot.lane.b32.xlu2 %v1646_v36, %s1265_s17  ;;  %v448_v40 = vrot.slane %v447_v60, 1 }
  0xe0   : > { %v569_v33 = vpop.permute.xlu1 %568  ;;  %v564_v56 = vpop.permute.xlu0 %563 }
  0xe1   : > { %v571_v58 = vadd.f32 %v569_v33, %v561_v29  ;;  %v566_v18 = vadd.f32 %v564_v56, %v560_v54  ;;  %v613_v4 = vpop.permute.xlu2 %612  ;;  %v1665_v10 = vadd.f32 %v448_v40, %v447_v60  ;;  %v283_v54 = vadd.f32 %v282_v32, %v281_v61 }
  0xe2   : > { %v457_v33 = vsel %vm194_vm0, %v347_v13, 0.0  ;;  %v286_v56 = vsel %vm194_vm0, %v1453_v59, 0.0 }
  0xe3   : > { %v575_v5 = vadd.f32 %v573_v48, %v566_v18  ;;  %v458_v57 = vrot.slane %v457_v33, 4 }
  0xe5   : > { %v459_v8 = vadd.f32 %v458_v57, %v457_v33 }
  0xe6   : > { %776 = vrot.lane.b32.xlu1 %v1646_v36, %s1267_s24  ;;  %772 = vrot.lane.b32.xlu0 %v1644_v21, %s1265_s17 }
  0xe7   : > { %780 = vrot.lane.b32.xlu2 %v1644_v21, %s1267_s24  ;;  %v460_v35 = vrot.slane %v459_v8, 2 }
  0xe8   : > { %v581_v11 = vpop.permute.xlu1 %580  ;;  %v577_v48 = vpop.permute.xlu0 %576 }
  0xe9   : > { %v583_v12 = vadd.f32 %v581_v11, %v575_v5  ;;  %v579_v16 = vadd.f32 %v577_v48, %v571_v58  ;;  %v629_v20 = vpop.permute.xlu2 %628  ;;  %v287_v58 = vrot.slane %v286_v56, 4  ;;  %v461_v31 = vadd.f32 %v460_v35, %v459_v8 }
  0xeb   : > { %v587_v19 = vadd.f32 %v585_v37, %v579_v16  ;;  %v588_v30 = vadd.f32 %v583_v12, %v1525_v63  ;;  %v284_v63 = vrot.slane %v283_v54, 1  ;;  %v288_v40 = vadd.f32 %v287_v58, %v286_v56 }
  0xed   : > { %v589_v50 = vadd.f32 %v587_v19, %v1523_v62  ;;  %v455_v62 = vrot.slane %v454_v44, 1  ;;  %v1688_v59 = vadd.f32 %v284_v63, %v283_v54  ;;  %v289_v34 = vrot.slane %v288_v40, 2 }
  0xee   : > { %792 = vrot.lane.b32.xlu1 %v1665_v10, %s1266_s23  ;;  %787 = vrot.lane.b32.xlu0 %v1667_v55, %s1266_s23 }
  0xef   : > { %796 = vrot.lane.b32.xlu2 %v1667_v55, %s1265_s17  ;;  %v1686_v6 = vadd.f32 %v455_v62, %v454_v44  ;;  %v290_v32 = vadd.f32 %v289_v34, %v288_v40 }
  0xf0   : > { %v597_v38 = vpop.permute.xlu1 %596  ;;  %v592_v39 = vpop.permute.xlu0 %591 }
  0xf1   : > { %v599_v43 = vadd.f32 %v597_v38, %v589_v50  ;;  %v594_v37 = vadd.f32 %v592_v39, %v588_v30  ;;  %v641_v24 = vpop.permute.xlu2 %640  ;;  %v464_v50 = vsel %vm194_vm0, %v348_v17, 0.0  ;;  %v293_v38 = vsel %vm194_vm0, %v1504_v45, 0.0 }
  0xf2   : > { %v465_v39 = vrot.slane %v464_v50, 4  ;;  %v294_v13 = vrot.slane %v293_v38, 4 }
  0xf3   : > { %v603_v29 = vadd.f32 %v601_v28, %v594_v37 }
  0xf4   : > { %v466_v33 = vadd.f32 %v465_v39, %v464_v50  ;;  %v295_v56 = vadd.f32 %v294_v13, %v293_v38 }
  0xf6   : > { %804 = vrot.lane.b32.xlu1 %v1667_v55, %s1267_s24  ;;  %800 = vrot.lane.b32.xlu0 %v1665_v10, %s1265_s17  ;;  %v467_v63 = vrot.slane %v466_v33, 2  ;;  %v296_v57 = vrot.slane %v295_v56, 2 }
  0xf7   : > { %808 = vrot.lane.b32.xlu2 %v1665_v10, %s1267_s24 }
  0xf8   : > { %v609_v18 = vpop.permute.xlu1 %608  ;;  %v605_v28 = vpop.permute.xlu0 %604  ;;  %v297_v35 = vadd.f32 %v296_v57, %v295_v56 }
  0xf9   : > { %v611_v60 = vadd.f32 %v609_v18, %v603_v29  ;;  %v607_v46 = vadd.f32 %v605_v28, %v599_v43  ;;  %v657_v5 = vpop.permute.xlu2 %656 }
  0xfb   : > { %v615_v42 = vadd.f32 %v613_v4, %v607_v46  ;;  %v616_v11 = vadd.f32 %v611_v60, %v1545_v26  ;;  %v291_v26 = vrot.slane %v290_v32, 1  ;;  %v349_v46 = vld.sshfl [vmem:[#allocation1 + $0x38] sm:$0xff pattern:$0x75316420] }
  0xfd   : > { %v617_v48 = vadd.f32 %v615_v42, %v1543_v25  ;;  %v462_v25 = vrot.slane %v461_v31, 1  ;;  %v1709_v45 = vadd.f32 %v291_v26, %v290_v32  ;;  %v468_v42 = vadd.f32 %v467_v63, %v466_v33 }
  0xfe   : > { %820 = vrot.lane.b32.xlu1 %v1686_v6, %s1266_s23  ;;  %815 = vrot.lane.b32.xlu0 %v1688_v59, %s1266_s23 }
  0xff   : > { %824 = vrot.lane.b32.xlu2 %v1688_v59, %s1265_s17  ;;  %v1707_v29 = vadd.f32 %v462_v25, %v461_v31 }
 0x100   : > { %v625_v12 = vpop.permute.xlu1 %624  ;;  %v620_v16 = vpop.permute.xlu0 %619 }
 0x101   : > { %v627_v61 = vadd.f32 %v625_v12, %v617_v48  ;;  %v622_v4 = vadd.f32 %v620_v16, %v616_v11  ;;  %v669_v19 = vpop.permute.xlu2 %668  ;;  %v471_v11 = vsel %vm194_vm0, %v349_v46, 0.0  ;;  %v300_v48 = vsel %vm194_vm0, %v1506_v47, 0.0 }
 0x102   : > { %v472_v12 = vrot.slane %v471_v11, 4  ;;  %v301_v16 = vrot.slane %v300_v48, 4 }
 0x103   : > { %v631_v30 = vadd.f32 %v629_v20, %v622_v4 }
 0x104   : > { %v302_v50 = vadd.f32 %v301_v16, %v300_v48 }
 0x106   : > { %832 = vrot.lane.b32.xlu1 %v1688_v59, %s1267_s24  ;;  %828 = vrot.lane.b32.xlu0 %v1686_v6, %s1265_s17  ;;  %v303_v26 = vrot.slane %v302_v50, 2 }
 0x107   : > { %836 = vrot.lane.b32.xlu2 %v1686_v6, %s1267_s24 }
 0x108   : > { %v637_v43 = vpop.permute.xlu1 %636  ;;  %v633_v20 = vpop.permute.xlu0 %632  ;;  %v304_v56 = vadd.f32 %v303_v26, %v302_v50 }
 0x109   : > { %v639_v37 = vadd.f32 %v637_v43, %v631_v30  ;;  %v635_v44 = vadd.f32 %v633_v20, %v627_v61  ;;  %v685_v54 = vpop.permute.xlu2 %684  ;;  %v473_v30 = vadd.f32 %v472_v12, %v471_v11 }
 0x10a   : > { %v305_v63 = vrot.slane %v304_v56, 1 }
 0x10b   : > { %v643_v62 = vadd.f32 %v641_v24, %v635_v44  ;;  %v644_v58 = vadd.f32 %v639_v37, %v1564_v53  ;;  %v298_v53 = vrot.slane %v297_v35, 1  ;;  %v474_v25 = vrot.slane %v473_v30, 2 }
 0x10c   : > { %v1748_v46 = vadd.f32 %v305_v63, %v304_v56 }
 0x10d   : > { %v645_v18 = vadd.f32 %v643_v62, %v1562_v52  ;;  %v469_v52 = vrot.slane %v468_v42, 1  ;;  %v1730_v47 = vadd.f32 %v298_v53, %v297_v35  ;;  %v475_v33 = vadd.f32 %v474_v25, %v473_v30 }
 0x10e   : > { %848 = vrot.lane.b32.xlu1 %v1707_v29, %s1266_s23  ;;  %843 = vrot.lane.b32.xlu0 %v1709_v45, %s1266_s23 }
 0x10f   : > { %852 = vrot.lane.b32.xlu2 %v1709_v45, %s1265_s17  ;;  %v1728_v32 = vadd.f32 %v469_v52, %v468_v42 }
 0x110   : > { %v653_v28 = vpop.permute.xlu1 %652  ;;  %v648_v60 = vpop.permute.xlu0 %647 }
 0x111   : > { %v655_v8 = vadd.f32 %v653_v28, %v645_v18  ;;  %v650_v24 = vadd.f32 %v648_v60, %v644_v58  ;;  %v697_v40 = vpop.permute.xlu2 %696 }
 0x113   : > { %v659_v34 = vadd.f32 %v657_v5, %v650_v24 }
 0x116   : > { %860 = vrot.lane.b32.xlu1 %v1709_v45, %s1267_s24  ;;  %856 = vrot.lane.b32.xlu0 %v1707_v29, %s1265_s17 }
 0x117   : > { %864 = vrot.lane.b32.xlu2 %v1707_v29, %s1267_s24 }
 0x118   : > { %v665_v17 = vpop.permute.xlu1 %664  ;;  %v661_v5 = vpop.permute.xlu0 %660 }
 0x119   : > { %v667_v61 = vadd.f32 %v665_v17, %v659_v34  ;;  %v663_v4 = vadd.f32 %v661_v5, %v655_v8  ;;  %v713_v31 = vpop.permute.xlu2 %712 }
 0x11b   : > { %v671_v38 = vadd.f32 %v669_v19, %v663_v4  ;;  %v672_v13 = vadd.f32 %v667_v61, %v1583_v15 }
 0x11d   : > { %v673_v39 = vadd.f32 %v671_v38, %v1581_v14  ;;  %v476_v14 = vrot.slane %v475_v33, 1 }
 0x11e   : > { %876 = vrot.lane.b32.xlu1 %v1728_v32, %s1266_s23  ;;  %871 = vrot.lane.b32.xlu0 %v1730_v47, %s1266_s23 }
 0x11f   : > { %880 = vrot.lane.b32.xlu2 %v1730_v47, %s1265_s17  ;;  %v1746_v60 = vadd.f32 %v476_v14, %v475_v33 }
 0x120   : > { %v681_v43 = vpop.permute.xlu1 %680  ;;  %v676_v20 = vpop.permute.xlu0 %675 }
 0x121   : > { %v683_v37 = vadd.f32 %v681_v43, %v673_v39  ;;  %v678_v44 = vadd.f32 %v676_v20, %v672_v13  ;;  %v725_v19 = vpop.permute.xlu2 %724 }
 0x123   : > { %v687_v62 = vadd.f32 %v685_v54, %v678_v44 }
 0x126   : > { %888 = vrot.lane.b32.xlu1 %v1730_v47, %s1267_s24  ;;  %884 = vrot.lane.b32.xlu0 %v1728_v32, %s1265_s17 }
 0x127   : > { %892 = vrot.lane.b32.xlu2 %v1728_v32, %s1267_s24 }
 0x128   : > { %v693_v15 = vpop.permute.xlu1 %692  ;;  %v689_v57 = vpop.permute.xlu0 %688 }
 0x129   : > { %v695_v58 = vadd.f32 %v693_v15, %v687_v62  ;;  %v691_v18 = vadd.f32 %v689_v57, %v683_v37  ;;  %v741_v28 = vpop.permute.xlu2 %740 }
 0x12b   : > { %v699_v54 = vadd.f32 %v697_v40, %v691_v18  ;;  %v700_v16 = vadd.f32 %v695_v58, %v1604_v3 }
 0x12d   : > { %v701_v30 = vadd.f32 %v699_v54, %v1602_v51 }
 0x12e   : > { %904 = vrot.lane.b32.xlu1 %v1746_v60, %s1266_s23  ;;  %899 = vrot.lane.b32.xlu0 %v1748_v46, %s1266_s23 }
 0x12f   : > { %908 = vrot.lane.b32.xlu2 %v1748_v46, %s1265_s17 }
 0x130   : > { %v709_v8 = vpop.permute.xlu1 %708  ;;  %v704_v24 = vpop.permute.xlu0 %703 }
 0x131   : > { %v753_v42 = vpop.permute.xlu2 %752  ;;  %v706_v5 = vadd.f32 %v704_v24, %v700_v16  ;;  %v711_v50 = vadd.f32 %v709_v8, %v701_v30 }
 0x133   : > { %v715_v38 = vadd.f32 %v713_v31, %v706_v5 }
 0x136   : > { %916 = vrot.lane.b32.xlu1 %v1748_v46, %s1267_s24  ;;  %912 = vrot.lane.b32.xlu0 %v1746_v60, %s1265_s17 }
 0x137   : > { %920 = vrot.lane.b32.xlu2 %v1746_v60, %s1267_s24 }
 0x138   : > { %v721_v40 = vpop.permute.xlu1 %720  ;;  %v717_v35 = vpop.permute.xlu0 %716 }
 0x139   : > { %v769_v34 = vpop.permute.xlu2 %768  ;;  %v723_v25 = vadd.f32 %v721_v40, %v715_v38  ;;  %v719_v26 = vadd.f32 %v717_v35, %v711_v50 }
 0x13b   : > { %v727_v20 = vadd.f32 %v725_v19, %v719_v26  ;;  %v728_v37 = vadd.f32 %v723_v25, %v1625_v49 }
 0x13d   : > { %v729_v33 = vadd.f32 %v727_v20, %v1623_v27 }
 0x140   : > { %v737_v11 = vpop.permute.xlu1 %736  ;;  %v732_v48 = vpop.permute.xlu0 %731 }
 0x141   : > { %v781_v52 = vpop.permute.xlu2 %780  ;;  %v734_v44 = vadd.f32 %v732_v48, %v728_v37  ;;  %v739_v3 = vadd.f32 %v737_v11, %v729_v33 }
 0x143   : > { %v743_v56 = vadd.f32 %v741_v28, %v734_v44 }
 0x148   : > { %v749_v53 = vpop.permute.xlu1 %748  ;;  %v745_v12 = vpop.permute.xlu0 %744 }
 0x149   : > { %v797_v17 = vpop.permute.xlu2 %796  ;;  %v751_v63 = vadd.f32 %v749_v53, %v743_v56  ;;  %v747_v15 = vadd.f32 %v745_v12, %v739_v3 }
 0x14b   : > { %v755_v57 = vadd.f32 %v753_v42, %v747_v15  ;;  %v756_v31 = vadd.f32 %v751_v63, %v1646_v36 }
 0x14d   : > { %v757_v19 = vadd.f32 %v755_v57, %v1644_v21 }
 0x150   : > { %v765_v61 = vpop.permute.xlu1 %764  ;;  %v760_v4 = vpop.permute.xlu0 %759 }
 0x151   : > { %v809_v39 = vpop.permute.xlu2 %808  ;;  %v762_v58 = vadd.f32 %v760_v4, %v756_v31  ;;  %v767_v8 = vadd.f32 %v765_v61, %v757_v19 }
 0x153   : > { %v771_v49 = vadd.f32 %v769_v34, %v762_v58 }
 0x158   : > { %v777_v13 = vpop.permute.xlu1 %776  ;;  %v773_v43 = vpop.permute.xlu0 %772 }
 0x159   : > { %v825_v51 = vpop.permute.xlu2 %824  ;;  %v779_v40 = vadd.f32 %v777_v13, %v771_v49  ;;  %v775_v27 = vadd.f32 %v773_v43, %v767_v8 }
 0x15b   : > { %v783_v11 = vadd.f32 %v781_v52, %v775_v27  ;;  %v784_v48 = vadd.f32 %v779_v40, %v1667_v55 }
 0x15d   : > { %v785_v42 = vadd.f32 %v783_v11, %v1665_v10 }
 0x160   : > { %v793_v62 = vpop.permute.xlu1 %792  ;;  %v788_v14 = vpop.permute.xlu0 %787 }
 0x161   : > { %v837_v24 = vpop.permute.xlu2 %836  ;;  %v790_v53 = vadd.f32 %v788_v14, %v784_v48  ;;  %v795_v36 = vadd.f32 %v793_v62, %v785_v42  ;;  %v1268_v62 = vmov 256.0  }
 0x162   : > { %1163 = vrcp.f32 %v1268_v62 }
 0x163   : > { %v799_v16 = vadd.f32 %v797_v17, %v790_v53 }
 0x168   : > { %v805_v18 = vpop.permute.xlu1 %804  ;;  %v801_v54 = vpop.permute.xlu0 %800 }
 0x169   : > { %v853_v12 = vpop.permute.xlu2 %852  ;;  %v807_v30 = vadd.f32 %v805_v18, %v799_v16  ;;  %v803_v21 = vadd.f32 %v801_v54, %v795_v36  ;;  %v1164_v57 = vpop.eup %1163 }
 0x16a   : > { %v925_v19 = vmul.f32 256.0, %v1164_v57  ;;  %vm929_vm1 = vweird.f32 %v1164_v57 }
 0x16b   : > { %v811_v61 = vadd.f32 %v809_v39, %v803_v21  ;;  %v812_v34 = vadd.f32 %v807_v30, %v1688_v59 }
 0x16d   : > { %v813_v52 = vadd.f32 %v811_v61, %v1686_v6 }
 0x170   : > { %v821_v35 = vpop.permute.xlu1 %820  ;;  %v816_v28 = vpop.permute.xlu0 %815 }
 0x171   : > { %v818_v50 = vadd.f32 %v816_v28, %v812_v34  ;;  %v865_v38 = vpop.permute.xlu2 %864  ;;  %v823_v55 = vadd.f32 %v821_v35, %v813_v52 }
 0x173   : > { %v827_v13 = vadd.f32 %v825_v51, %v818_v50 }
 0x178   : > { %v833_v5 = vpop.permute.xlu1 %832  ;;  %v829_v4 = vpop.permute.xlu0 %828 }
 0x179   : > { %v835_v43 = vadd.f32 %v833_v5, %v827_v13  ;;  %v831_v10 = vadd.f32 %v829_v4, %v823_v55  ;;  %v881_v33 = vpop.permute.xlu2 %880 }
 0x17b   : > { %v839_v17 = vadd.f32 %v837_v24, %v831_v10  ;;  %v840_v44 = vadd.f32 %v835_v43, %v1709_v45  ;;  %v926_v24 = vsub.f32 1.0, %v925_v19 }
 0x17d   : > { %v841_v39 = vadd.f32 %v839_v17, %v1707_v29  ;;  %v927_v48 = vmul.f32 %v1164_v57, %v926_v24 }
 0x180   : > { %v849_v25 = vpop.permute.xlu1 %848  ;;  %v844_v26 = vpop.permute.xlu0 %843 }
 0x181   : > { %v846_v3 = vadd.f32 %v844_v26, %v840_v44  ;;  %v851_v59 = vadd.f32 %v849_v25, %v841_v39  ;;  %v893_v51 = vpop.permute.xlu2 %892 }
 0x183   : > { %v855_v56 = vadd.f32 %v853_v12, %v846_v3 }
 0x188   : > { %v861_v20 = vpop.permute.xlu1 %860  ;;  %v857_v37 = vpop.permute.xlu0 %856 }
 0x189   : > { %v863_v6 = vadd.f32 %v861_v20, %v855_v56  ;;  %v859_v15 = vadd.f32 %v857_v37, %v851_v59  ;;  %v909_v35 = vpop.permute.xlu2 %908 }
 0x18b   : > { %v867_v31 = vadd.f32 %v865_v38, %v859_v15  ;;  %v868_v58 = vadd.f32 %v863_v6, %v1730_v47  ;;  %v928_v47 = vadd.f32 %v1164_v57, %v927_v48 }
 0x18d   : > { %v869_v8 = vadd.f32 %v867_v31, %v1728_v32  ;;  %v930_v4 = vsel %vm929_vm1, %v1164_v57, %v928_v47 }
 0x190   : > { %v877_v14 = vpop.permute.xlu1 %876  ;;  %v872_v63 = vpop.permute.xlu0 %871 }
 0x191   : > { %v874_v18 = vadd.f32 %v872_v63, %v868_v58  ;;  %v879_v29 = vadd.f32 %v877_v14, %v869_v8  ;;  %v921_v32 = vpop.permute.xlu2 %920 }
 0x193   : > { %v883_v49 = vadd.f32 %v881_v33, %v874_v18 }
 0x198   : > { %v889_v54 = vpop.permute.xlu1 %888  ;;  %v885_v45 = vpop.permute.xlu0 %884 }
 0x199   : > { %v891_v40 = vadd.f32 %v889_v54, %v883_v49  ;;  %v887_v27 = vadd.f32 %v885_v45, %v879_v29 }
 0x19b   : > { %v895_v53 = vadd.f32 %v893_v51, %v887_v27  ;;  %v896_v42 = vadd.f32 %v891_v40, %v1748_v46 }
 0x19d   : > { %v897_v36 = vadd.f32 %v895_v53, %v1746_v60 }
 0x1a0   : > { %v905_v28 = vpop.permute.xlu1 %904  ;;  %v900_v11 = vpop.permute.xlu0 %899 }
 0x1a1   : > { %v902_v12 = vadd.f32 %v900_v11, %v896_v42  ;;  %v907_v16 = vadd.f32 %v905_v28, %v897_v36 }
 0x1a3   : > { %v911_v5 = vadd.f32 %v909_v35, %v902_v12 }
 0x1a8   : > { %v917_v30 = vpop.permute.xlu1 %916  ;;  %v913_v21 = vpop.permute.xlu0 %912 }
 0x1a9   : > { %v919_v61 = vadd.f32 %v917_v30, %v911_v5  ;;  %v915_v34 = vadd.f32 %v913_v21, %v907_v16 }
 0x1ab   : > { %v931_v50 = vmul.f32 %v930_v4, %v919_v61  ;;  %v923_v38 = vadd.f32 %v921_v32, %v915_v34 }
 0x1ad   : > { %v932_v25 = vmul.f32 %v930_v4, %v923_v38  ;;  %v933_v26 = vmul.f32 %v931_v50, %v931_v50  ;;  %954 = vrot.lane.b32.xlu2 %v931_v50, %s1266_s23  ;;  %951 = vrot.lane.b32.xlu1 %v931_v50, %s1265_s17 }
 0x1ae   : > { %948 = vrot.lane.b32.xlu0 %v931_v50, %s1267_s24 }
 0x1af   : > { %v934_v60 = vsub.f32 %v932_v25, %v933_v26 }
 0x1b1   : > { %v935_v46 = vmax.f32 %v934_v60, 0.0 }
 0x1b3   : > { %v936_v52 = vadd.f32 1e-05, %v935_v46 }
 0x1b5   : > { %1165 = vrsqrt.f32 %v936_v52  ;;  %vm943_vm3 = vweird.f32 %v936_v52 }
 0x1bb   : > { %v1166_v55 = vpop.eup %1165 }
 0x1bc   : > { %v938_v13 = vmul.f32 %v1166_v55, %v936_v52  ;;  %vm944_vm2 = vweird.f32 %v1166_v55 }
 0x1bd   : > { %vm945_vm4 = vmor %vm943_vm3, %vm944_vm2 }
 0x1be   : > { %v939_v43 = vmul.f32 %v1166_v55, %v938_v13 }
 0x1c0   : > { %v940_v10 = vmul.f32 0.5, %v939_v43 }
 0x1c2   : > { %v941_v20 = vsub.f32 1.5, %v940_v10 }
 0x1c4   : > { %v942_v37 = vmul.f32 %v1166_v55, %v941_v20 }
 0x1c6   : > { %v946_v17 = vsel %vm945_vm4, %v1166_v55, %v942_v37 }
 0x1c7   : > { %970 = vrot.lane.b32.xlu2 %v946_v17, %s1266_s23  ;;  %967 = vrot.lane.b32.xlu1 %v946_v17, %s1265_s17 }
 0x1c8   : > { %964 = vrot.lane.b32.xlu0 %v946_v17, %s1267_s24 }
 0x207   : > { %v955_v59 = vpop.permute.xlu2 %954 }
 0x21f   : > { %v952_v33 = vpop.permute.xlu1 %951 }
 0x220   : > { %v949_v44 = vpop.permute.xlu0 %948 }
 0x221   : > { %v958_v3 = vsel %vm957_vm5, %v931_v50, %v949_v44  ;;  %v971_v51 = vpop.permute.xlu2 %970 }
 0x222   : > { %v960_v39 = vsel %vm959_vm6, %v958_v3, %v952_v33 }
 0x223   : > { %v962_v56 = vsel %vm961_vm7, %v960_v39, %v955_v59 }
 0x224   : > { %v976_v62 = vperm.slane %v962_v56, 0 }
 0x226   : > { %v978_v63 = vrot.slane %v976_v62, 4 }
 0x228   : > { %v979_v58 = vsel %vm194_vm0, %v976_v62, %v978_v63 }
 0x229   : > { %v981_v45 = vsub.f32 %v1378_v0, %v979_v58  ;;  %v982_v19 = vsub.f32 %v1381_v1, %v979_v58  ;;  %v983_v8 = vsub.f32 %v1407_v23, %v979_v58  ;;  %v984_v29 = vsub.f32 %v1469_v9, %v979_v58 }
 0x22a   : > { %v985_v24 = vsub.f32 %v1386_v2, %v979_v58  ;;  %v986_v28 = vsub.f32 %v1392_v7, %v979_v58  ;;  %v987_v0 = vsub.f32 %v1431_v41, %v979_v58  ;;  %v988_v23 = vsub.f32 %v1483_v22, %v979_v58 }
 0x239   : > { %v968_v14 = vpop.permute.xlu1 %967 }
 0x23a   : > { %v965_v6 = vpop.permute.xlu0 %964 }
 0x23b   : > { %v973_v15 = vsel %vm957_vm5, %v946_v17, %v965_v6 }
 0x23c   : > { %v974_v57 = vsel %vm959_vm6, %v973_v15, %v968_v14 }
 0x23d   : > { %v975_v31 = vsel %vm961_vm7, %v974_v57, %v971_v51 }
 0x23e   : > { %v989_v18 = vperm.slane %v975_v31, 0 }
 0x240   : > { %v991_v54 = vrot.slane %v989_v18, 4 }
 0x242   : > { %v992_v49 = vsel %vm194_vm0, %v989_v18, %v991_v54 }
 0x243   : > { %v994_v40 = vmul.f32 %v992_v49, %v981_v45  ;;  %v995_v27 = vmul.f32 %v992_v49, %v982_v19  ;;  %v996_v35 = vmul.f32 %v992_v49, %v983_v8  ;;  %v997_v11 = vmul.f32 %v992_v49, %v984_v29 }
 0x244   : > { %v998_v1 = vmul.f32 %v992_v49, %v985_v24  ;;  %v999_v2 = vmul.f32 %v992_v49, %v986_v28  ;;  %v1000_v9 = vmul.f32 %v992_v49, %v987_v0  ;;  %v1001_v7 = vmul.f32 %v992_v49, %v988_v23 }
 0x245   : > { %1002 = vst [vmem:[%s134_s10] sm:$0xff] %v994_v40 }
 0x246   : > { %1003 = vst [vmem:[%s134_s10 + $0x8] sm:$0xff] %v995_v27 }
 0x247   : > { %1004 = vst [vmem:[%s134_s10 + $0x10] sm:$0xff] %v996_v35 }
 0x248   : > { %1005 = vst [vmem:[%s134_s10 + $0x18] sm:$0xff] %v997_v11 }
 0x249   : > { %1006 = vst [vmem:[%s134_s10 + $0x20] sm:$0xff] %v998_v1 }
 0x24a   : > { %1007 = vst [vmem:[%s134_s10 + $0x28] sm:$0xff] %v999_v2 }
 0x24b   : > { %1008 = vst [vmem:[%s134_s10 + $0x30] sm:$0xff] %v1000_v9 }
 0x24c   : > { %1009 = vst [vmem:[%s134_s10 + $0x38] sm:$0xff] %v1001_v7 }
 0x24d   : > { %1224 = shalt.err (!%p1221_p4)
}
 0x24e   : > { %1115 = dma.vmem_to_hbm [thread:$0]  (%p1329_p11), %s1025_s29, 1024, %s1027_s30, %s1011_s2  }
 0x24f PF: > { %s1038_s16 = sand.u32 1, %s1251_s6   ;;  %p1836_p7 = scmp.ge.s32.totalorder %s1263_s9, 2 }
 0x250   : > { %s1039_s21 = scalar_lea.sflag [#allocation4], %s1038_s16 }
 0x251   : > { %p1122_p5 = pnand %p1836_p7, %p1333_p12 }
 0x253   : > { %p1123_p8 = pneg %p1122_p5 }
 0x255   : > { %1246 = dma.done.wait (%p1123_p8), %s1039_s21, 1024  }
 0x256   : > { %1248 = vsyncadd (%p1123_p8), %s1039_s21, 4294966272  ;;  %p14_p10 = scmp.ge.s32.totalorder %s1304_s12, 4   ;;  %s1837_s6 = smov %s1255_s7 }
 0x257   : > { %s1838_s7 = smov %s1259_s8  ;;  %s1839_s8 = smov %s1316_s15 }
 0x258   : > { %s1840_s9 = smov %s1304_s12  ;;  %16 = sbr.rel (!%p14_p10) target bundleno = 5 (0x5), region = 75 }
 0x25d   :  { %1045 = vsyncpa [#allocation3], 1 }
 0x25e   :  { %1047 = vsyncpa [#allocation3 + $0x1], 1 }
 0x25f   :  { %1048 = vsyncpa [#allocation4], 1 }
 0x260   :  { %1050 = vsyncpa [#allocation4 + $0x1], 1 }

</bundles_post_ra>
